<compile_context>
chip_gen: v7x
topology: tpu7x:2x2x1
jax: 0.10.0
libtpu: 0.0.40
codegen_flags: <defaults>
</compile_context>

<pallas_src>
import functools

import jax
import jax.numpy as jnp
import numpy as np
from jax.experimental import pallas as pl
from jax.experimental.pallas import tpu as pltpu


# ---------------------------------------------------------------------------
# Static helpers (trace time)
# ---------------------------------------------------------------------------
def _make_taps(kernel_size, dilation):
    half = kernel_size // 2
    return tuple(((i - half) * dilation, (j - half) * dilation)
                 for i in range(kernel_size) for j in range(kernel_size))


def _make_masks(h, w, taps):
    """Per-tap {0,1} validity masks of the zero-padded integer-offset sampling."""
    col = np.arange(h * w) % w
    row = np.arange(h * w) // w
    ms = []
    for (u, v) in taps:
        ok = ((col + u >= 0) & (col + u < w) & (row + v >= 0) & (row + v < h))
        ms.append(ok.astype(np.float32))
    return jnp.asarray(np.stack(ms, axis=0)[:, None, :])      # (T, 1, h*w)


# ---------------------------------------------------------------------------
# Fused kernel: both AttAlign stages for every non-reference frame of ONE
# batch element.  Images are lane-dense (C, H*W); weights are VMEM columns,
# biases SMEM scalars, tap masks a resident constant-index VMEM input.
# ---------------------------------------------------------------------------
def _att_module_kernel(x_ref, m1_ref, m2_ref, w_ref, b_ref, out_ref, *,
                       n, c, cr, hw, img_w, taps1, taps2):
    nh = n // 2
    nfr = n - 1                                   # frames aligned per clip

    xclip = x_ref[0]                              # (n, c, hw) f32
    ref_img = xclip[nh]                           # (c, hw)
    frames = [xclip[f] for f in range(n) if f != nh]   # nfr x (c, hw)

    def shift_of(u, v):
        # shifted[p] = src[p + v*img_w + u]; wraparound killed by the tap mask
        return (-(v * img_w + u)) % hw

    def roll2(a, s):
        return a if s == 0 else pltpu.roll(a, s, axis=1)   # XLU lane rotate

    def conv_q_rows(qoff):
        # Q = conv_q(ref): full-tile multiply + XLU sublane reduce per row.
        rows = []
        for o in range(cr):
            r = jnp.sum(ref_img * w_ref[qoff + o], axis=0, keepdims=True)
            rows.append(r + b_ref[qoff + o])      # (1, hw)
        return rows

    def conv_k_rows(frame_list, koff):
        # K = conv_k(frames): one frame-batched (nfr, hw) plane per row.
        outs = []
        for o in range(cr):
            w_o = w_ref[koff + o]                 # (c, 1) VMEM column
            rows = [jnp.sum(fr * w_o, axis=0, keepdims=True)
                    for fr in frame_list]
            k_o = rows[0] if nfr == 1 else jnp.concatenate(rows, axis=0)
            outs.append(k_o + b_ref[koff + o])    # (nfr, hw)
        return outs

    def stage(frame_list, qoff, koff, m_ref, taps):
        q_rows = conv_q_rows(qoff)
        k_rows = conv_k_rows(frame_list, koff)
        fr2 = (frame_list[0] if nfr == 1
               else jnp.concatenate(frame_list, axis=0))     # (nfr*c, hw)

        # --- masked per-tap scores, frame-batched on the sublane axis.
        scores = []
        for t, (u, v) in enumerate(taps):
            s = shift_of(u, v)
            raw = None
            for o in range(cr):
                term = roll2(k_rows[o], s) * q_rows[o]       # (nfr, hw)
                raw = term if raw is None else raw + term
            scores.append(raw * m_ref[t])                    # OOB score -> 0

        mmax = scores[0]
        for sc in scores[1:]:
            mmax = jnp.maximum(mmax, sc)                     # (nfr, hw)

        # --- streaming softmax fused with the weighted-value accumulation.
        denom = jnp.zeros((nfr, hw), jnp.float32)
        acc = [jnp.zeros((c, hw), jnp.float32) for _ in range(nfr)]
        for t, (u, v) in enumerate(taps):
            s = shift_of(u, v)
            e = jnp.exp(scores[t] - mmax)                    # (nfr, hw)
            denom = denom + e
            wt = e * m_ref[t]                                # kill wrapped taps
            rv = roll2(fr2, s)                               # (nfr*c, hw)
            for f in range(nfr):
                acc[f] = acc[f] + wt[f:f + 1, :] * rv[f * c:(f + 1) * c, :]

        # TODO(synk): pl.reciprocal(approx=True) is a free EUP win if the
        # accuracy budget is relaxed; kept exact for the 1e-4/1e-5 check.
        inv = pl.reciprocal(denom, approx=False)             # (nfr, hw)
        return [acc[f] * inv[f:f + 1, :] for f in range(nfr)]

    x1 = stage(frames, 0, cr, m1_ref, taps1)          # AttAlign, dilation=3
    x2 = stage(x1, 2 * cr, 3 * cr, m2_ref, taps2)     # AttAlign, dilation=1
    out_ref[0] = jnp.stack(x2, axis=0).astype(out_ref.dtype)


# ---------------------------------------------------------------------------
# AttModule forward: thin JAX glue, hot path in one fused Pallas kernel.
# ---------------------------------------------------------------------------
def att_module_forward(x, params):
    """x: (B, N, C, H, W). params = (p_align1, p_align2), each (wq, bq, wk, bk)."""
    p1, p2 = params
    b, n, c, h, w = x.shape
    nh = n // 2
    pairs = n // 2
    nfr = n - 1
    hw = h * w
    cr = p1[0].shape[0]
    ksz = 3

    taps1 = _make_taps(ksz, 3)
    taps2 = _make_taps(ksz, 1)
    ntap = ksz * ksz
    m1 = _make_masks(h, w, taps1)                       # (ntap, 1, hw)
    m2 = _make_masks(h, w, taps2)

    # [wq1; wk1; wq2; wk2] as VMEM (c,1) columns; biases as SMEM scalars.
    w_all = jnp.concatenate([p1[0], p1[2], p2[0], p2[2]], axis=0)
    w_all = w_all.reshape(4 * cr, c, 1).astype(jnp.float32)
    b_all = jnp.concatenate([p1[1], p1[3], p2[1], p2[3]],
                            axis=0).astype(jnp.float32)

    x4 = x.reshape(b, n, c, hw)                         # lane-dense planes

    kern = functools.partial(_att_module_kernel, n=n, c=c, cr=cr, hw=hw,
                             img_w=w, taps1=taps1, taps2=taps2)

    aligned = pl.pallas_call(
        kern,
        out_shape=jax.ShapeDtypeStruct((b, nfr, c, hw), x.dtype),
        grid=(b,),
        in_specs=[
            pl.BlockSpec((1, n, c, hw), lambda i: (i, 0, 0, 0)),
            pl.BlockSpec((ntap, 1, hw), lambda i: (0, 0, 0)),
            pl.BlockSpec((ntap, 1, hw), lambda i: (0, 0, 0)),
            pl.BlockSpec((4 * cr, c, 1), lambda i: (0, 0, 0)),
            pl.BlockSpec(memory_space=pltpu.MemorySpace.SMEM),
        ],
        out_specs=pl.BlockSpec((1, nfr, c, hw), lambda i: (i, 0, 0, 0)),
        compiler_params=pltpu.CompilerParams(
            dimension_semantics=("parallel",)),
    )(x4, m1, m2, w_all, b_all)

    aligned = aligned.reshape(b, nfr, c, h, w)
    x_ref_img = x[:, nh]
    outs = []
    for i in range(pairs):
        outs.append(jnp.concatenate(
            [aligned[:, i], x_ref_img, aligned[:, nfr - 1 - i]], axis=1))
    return jnp.stack(outs, axis=1)                      # (B, pairs, 3C, H, W)


# ---------------------------------------------------------------------------
# Pure-JAX reference (for the correctness check)
# ---------------------------------------------------------------------------
def _ref_shift(t, u, v):
    b, c, h, w = t.shape
    ph, pw = abs(v), abs(u)
    padded = jnp.pad(t, ((0, 0), (0, 0), (ph, ph), (pw, pw)))
    return padded[:, :, ph + v: ph + v + h, pw + u: pw + u + w]


def _ref_att_align(x, ref_img, wq, bq, wk, bk, kernel_size, dilation):
    buf = jnp.einsum("oc,bchw->bohw", wk, x) + bk[None, :, None, None]
    q = jnp.einsum("oc,bchw->bohw", wq, ref_img) + bq[None, :, None, None]
    half = kernel_size // 2
    ks, vs = [], []
    for i in range(kernel_size):
        for j in range(kernel_size):
            u, v = (i - half) * dilation, (j - half) * dilation
            ks.append(_ref_shift(buf, u, v))
            vs.append(_ref_shift(x, u, v))
    k = jnp.stack(ks, axis=1)
    vv = jnp.stack(vs, axis=1)
    score = jnp.sum(k * q[:, None], axis=2)
    att = jax.nn.softmax(score, axis=1)
    return jnp.sum(vv * att[:, :, None], axis=1)


def _ref_att_module(x, params):
    p1, p2 = params
    b, n, c, h, w = x.shape
    x_ref = x[:, n // 2]
    outs = []
    for i in range(n // 2):
        x_n1 = x[:, i]
        x_n2 = x[:, n - 1 - i]
        x_n1 = _ref_att_align(x_n1, x_ref, *p1, 3, 3)
        x_n2 = _ref_att_align(x_n2, x_ref, *p1, 3, 3)
        x_n1 = _ref_att_align(x_n1, x_ref, *p2, 3, 1)
        x_n2 = _ref_att_align(x_n2, x_ref, *p2, 3, 1)
        outs.append(jnp.concatenate([x_n1, x_ref, x_n2], axis=1))
    return jnp.stack(outs, axis=1)


# ---------------------------------------------------------------------------
if __name__ == "__main__":
    nf = 8          # channels (rd=8 -> reduced channels = 1)
    rd = 8
    cr = nf // rd
    b, n, h, w = 2, 3, 16, 16

    key = jax.random.PRNGKey(0)
    ks = jax.random.split(key, 9)

    # deterministic synthetic parameters (PyTorch 1x1 conv (out,in,1,1) -> (out,in))
    def make_params(k0, k1, k2, k3):
        wq = 0.1 * jax.random.normal(k0, (cr, nf), jnp.float32)
        bq = 0.1 * jax.random.normal(k1, (cr,), jnp.float32)
        wk = 0.1 * jax.random.normal(k2, (cr, nf), jnp.float32)
        bk = 0.1 * jax.random.normal(k3, (cr,), jnp.float32)
        return (wq, bq, wk, bk)

    p_align1 = make_params(ks[0], ks[1], ks[2], ks[3])
    p_align2 = make_params(ks[4], ks[5], ks[6], ks[7])
    params = (p_align1, p_align2)

    x = jax.random.normal(ks[8], (b, n, nf, h, w), jnp.float32)

    out = att_module_forward(x, params)
    out = jax.block_until_ready(out)

    ref = jax.block_until_ready(_ref_att_module(x, params))
    assert out.shape == (b, n // 2, 3 * nf, h, w), out.shape
    np.testing.assert_allclose(np.asarray(out), np.asarray(ref),
                               rtol=1e-4, atol=1e-5)
    print("KERNEL_OK")
</pallas_src>

<mosaic_0001>
module attributes {stable_mosaic.version = 11 : i64} {
  func.func @_att_module_kernel(%arg0: i32, %arg1: memref<1x3x8x256xf32, #tpu.memory_space<vmem>>, %arg2: memref<9x1x256xf32, #tpu.memory_space<vmem>>, %arg3: memref<9x1x256xf32, #tpu.memory_space<vmem>>, %arg4: memref<4x8x1xf32, #tpu.memory_space<vmem>>, %arg5: memref<4xf32, #tpu.memory_space<smem>>, %arg6: memref<1x2x8x256xf32, #tpu.memory_space<vmem>>) attributes {dimension_semantics = [#tpu.dimension_semantics<parallel>], iteration_bounds = array<i64: 2>, scalar_prefetch = 0 : i64, scratch_operands = 0 : i64, tpu.core_type = #tpu.core_type<tc>, window_params = [{transform_indices = @transform_0, window_bounds = array<i64: 1, 3, 8, 256>}, {pipeline_mode = #tpu.pipeline_mode<synchronous>, transform_indices = @transform_1, window_bounds = array<i64: 9, 1, 256>}, {pipeline_mode = #tpu.pipeline_mode<synchronous>, transform_indices = @transform_2, window_bounds = array<i64: 9, 1, 256>}, {pipeline_mode = #tpu.pipeline_mode<synchronous>, transform_indices = @transform_3, window_bounds = array<i64: 4, 8, 1>}, {transform_indices = @transform_4, window_bounds = array<i64: 4>}, {transform_indices = @transform_5, window_bounds = array<i64: 1, 2, 8, 256>}]} {
    %c0 = arith.constant 0 : index
    %c0_0 = arith.constant 0 : index
    %c0_1 = arith.constant 0 : index
    %c0_2 = arith.constant 0 : index
    %0 = vector.load %arg1[%c0, %c0_0, %c0_1, %c0_2] : memref<1x3x8x256xf32, #tpu.memory_space<vmem>>, vector<1x3x8x256xf32>
    %1 = vector.shape_cast %0 : vector<1x3x8x256xf32> to vector<3x8x256xf32>
    %2 = vector.extract_strided_slice %1 {offsets = [1, 0, 0], sizes = [1, 8, 256], strides = [1, 1, 1]} : vector<3x8x256xf32> to vector<1x8x256xf32>
    %3 = vector.shape_cast %2 : vector<1x8x256xf32> to vector<8x256xf32>
    %4 = vector.extract_strided_slice %1 {offsets = [0, 0, 0], sizes = [1, 8, 256], strides = [1, 1, 1]} : vector<3x8x256xf32> to vector<1x8x256xf32>
    %5 = vector.shape_cast %4 : vector<1x8x256xf32> to vector<8x256xf32>
    %6 = vector.extract_strided_slice %1 {offsets = [2, 0, 0], sizes = [1, 8, 256], strides = [1, 1, 1]} : vector<3x8x256xf32> to vector<1x8x256xf32>
    %7 = vector.shape_cast %6 : vector<1x8x256xf32> to vector<8x256xf32>
    %c0_3 = arith.constant 0 : index
    %c0_4 = arith.constant 0 : index
    %c0_5 = arith.constant 0 : index
    %8 = vector.load %arg4[%c0_3, %c0_4, %c0_5] : memref<4x8x1xf32, #tpu.memory_space<vmem>>, vector<1x8x1xf32>
    %9 = vector.shape_cast %8 : vector<1x8x1xf32> to vector<8x1xf32>
    %10 = vector.broadcast %9 : vector<8x1xf32> to vector<8x256xf32>
    %11 = arith.mulf %3, %10 : vector<8x256xf32>
    %cst = arith.constant dense<0.000000e+00> : vector<256xf32>
    %12 = vector.multi_reduction <add>, %11, %cst [0] : vector<8x256xf32> to vector<256xf32>
    %13 = vector.shape_cast %12 : vector<256xf32> to vector<1x256xf32>
    %c0_6 = arith.constant 0 : index
    %14 = memref.load %arg5[%c0_6] : memref<4xf32, #tpu.memory_space<smem>>
    %15 = vector.broadcast %14 : f32 to vector<1x256xf32>
    %16 = arith.addf %13, %15 : vector<1x256xf32>
    %c1 = arith.constant 1 : index
    %c0_7 = arith.constant 0 : index
    %c0_8 = arith.constant 0 : index
    %17 = vector.load %arg4[%c1, %c0_7, %c0_8] : memref<4x8x1xf32, #tpu.memory_space<vmem>>, vector<1x8x1xf32>
    %18 = vector.shape_cast %17 : vector<1x8x1xf32> to vector<8x1xf32>
    %19 = vector.broadcast %18 : vector<8x1xf32> to vector<8x256xf32>
    %20 = arith.mulf %5, %19 : vector<8x256xf32>
    %cst_9 = arith.constant dense<0.000000e+00> : vector<256xf32>
    %21 = vector.multi_reduction <add>, %20, %cst_9 [0] : vector<8x256xf32> to vector<256xf32>
    %22 = vector.shape_cast %21 : vector<256xf32> to vector<1x256xf32>
    %23 = vector.broadcast %18 : vector<8x1xf32> to vector<8x256xf32>
    %24 = arith.mulf %7, %23 : vector<8x256xf32>
    %cst_10 = arith.constant dense<0.000000e+00> : vector<256xf32>
    %25 = vector.multi_reduction <add>, %24, %cst_10 [0] : vector<8x256xf32> to vector<256xf32>
    %26 = vector.shape_cast %25 : vector<256xf32> to vector<1x256xf32>
    %27 = tpu.concatenate %22, %26 in 0 : vector<1x256xf32>, vector<1x256xf32> -> vector<2x256xf32>
    %c1_11 = arith.constant 1 : index
    %28 = memref.load %arg5[%c1_11] : memref<4xf32, #tpu.memory_space<smem>>
    %29 = vector.broadcast %28 : f32 to vector<2x256xf32>
    %30 = arith.addf %27, %29 : vector<2x256xf32>
    %31 = tpu.concatenate %5, %7 in 0 : vector<8x256xf32>, vector<8x256xf32> -> vector<16x256xf32>
    %c51_i32 = arith.constant 51 : i32
    %32 = tpu.dynamic_rotate %30 by %c51_i32 dim 1 : vector<2x256xf32>, i32 -> vector<2x256xf32>
    %33 = vector.broadcast %16 : vector<1x256xf32> to vector<2x256xf32>
    %34 = arith.mulf %32, %33 : vector<2x256xf32>
    %c0_12 = arith.constant 0 : index
    %c0_13 = arith.constant 0 : index
    %c0_14 = arith.constant 0 : index
    %35 = vector.load %arg2[%c0_12, %c0_13, %c0_14] : memref<9x1x256xf32, #tpu.memory_space<vmem>>, vector<1x1x256xf32>
    %36 = vector.shape_cast %35 : vector<1x1x256xf32> to vector<1x256xf32>
    %37 = vector.broadcast %36 : vector<1x256xf32> to vector<2x256xf32>
    %38 = arith.mulf %34, %37 : vector<2x256xf32>
    %c3_i32 = arith.constant 3 : i32
    %39 = tpu.dynamic_rotate %30 by %c3_i32 dim 1 : vector<2x256xf32>, i32 -> vector<2x256xf32>
    %40 = vector.broadcast %16 : vector<1x256xf32> to vector<2x256xf32>
    %41 = arith.mulf %39, %40 : vector<2x256xf32>
    %c1_15 = arith.constant 1 : index
    %c0_16 = arith.constant 0 : index
    %c0_17 = arith.constant 0 : index
    %42 = vector.load %arg2[%c1_15, %c0_16, %c0_17] : memref<9x1x256xf32, #tpu.memory_space<vmem>>, vector<1x1x256xf32>
    %43 = vector.shape_cast %42 : vector<1x1x256xf32> to vector<1x256xf32>
    %44 = vector.broadcast %43 : vector<1x256xf32> to vector<2x256xf32>
    %45 = arith.mulf %41, %44 : vector<2x256xf32>
    %c211_i32 = arith.constant 211 : i32
    %46 = tpu.dynamic_rotate %30 by %c211_i32 dim 1 : vector<2x256xf32>, i32 -> vector<2x256xf32>
    %47 = vector.broadcast %16 : vector<1x256xf32> to vector<2x256xf32>
    %48 = arith.mulf %46, %47 : vector<2x256xf32>
    %c2 = arith.constant 2 : index
    %c0_18 = arith.constant 0 : index
    %c0_19 = arith.constant 0 : index
    %49 = vector.load %arg2[%c2, %c0_18, %c0_19] : memref<9x1x256xf32, #tpu.memory_space<vmem>>, vector<1x1x256xf32>
    %50 = vector.shape_cast %49 : vector<1x1x256xf32> to vector<1x256xf32>
    %51 = vector.broadcast %50 : vector<1x256xf32> to vector<2x256xf32>
    %52 = arith.mulf %48, %51 : vector<2x256xf32>
    %c48_i32 = arith.constant 48 : i32
    %53 = tpu.dynamic_rotate %30 by %c48_i32 dim 1 : vector<2x256xf32>, i32 -> vector<2x256xf32>
    %54 = vector.broadcast %16 : vector<1x256xf32> to vector<2x256xf32>
    %55 = arith.mulf %53, %54 : vector<2x256xf32>
    %c3 = arith.constant 3 : index
    %c0_20 = arith.constant 0 : index
    %c0_21 = arith.constant 0 : index
    %56 = vector.load %arg2[%c3, %c0_20, %c0_21] : memref<9x1x256xf32, #tpu.memory_space<vmem>>, vector<1x1x256xf32>
    %57 = vector.shape_cast %56 : vector<1x1x256xf32> to vector<1x256xf32>
    %58 = vector.broadcast %57 : vector<1x256xf32> to vector<2x256xf32>
    %59 = arith.mulf %55, %58 : vector<2x256xf32>
    %60 = vector.broadcast %16 : vector<1x256xf32> to vector<2x256xf32>
    %61 = arith.mulf %30, %60 : vector<2x256xf32>
    %c4 = arith.constant 4 : index
    %c0_22 = arith.constant 0 : index
    %c0_23 = arith.constant 0 : index
    %62 = vector.load %arg2[%c4, %c0_22, %c0_23] : memref<9x1x256xf32, #tpu.memory_space<vmem>>, vector<1x1x256xf32>
    %63 = vector.shape_cast %62 : vector<1x1x256xf32> to vector<1x256xf32>
    %64 = vector.broadcast %63 : vector<1x256xf32> to vector<2x256xf32>
    %65 = arith.mulf %61, %64 : vector<2x256xf32>
    %c208_i32 = arith.constant 208 : i32
    %66 = tpu.dynamic_rotate %30 by %c208_i32 dim 1 : vector<2x256xf32>, i32 -> vector<2x256xf32>
    %67 = vector.broadcast %16 : vector<1x256xf32> to vector<2x256xf32>
    %68 = arith.mulf %66, %67 : vector<2x256xf32>
    %c5 = arith.constant 5 : index
    %c0_24 = arith.constant 0 : index
    %c0_25 = arith.constant 0 : index
    %69 = vector.load %arg2[%c5, %c0_24, %c0_25] : memref<9x1x256xf32, #tpu.memory_space<vmem>>, vector<1x1x256xf32>
    %70 = vector.shape_cast %69 : vector<1x1x256xf32> to vector<1x256xf32>
    %71 = vector.broadcast %70 : vector<1x256xf32> to vector<2x256xf32>
    %72 = arith.mulf %68, %71 : vector<2x256xf32>
    %c45_i32 = arith.constant 45 : i32
    %73 = tpu.dynamic_rotate %30 by %c45_i32 dim 1 : vector<2x256xf32>, i32 -> vector<2x256xf32>
    %74 = vector.broadcast %16 : vector<1x256xf32> to vector<2x256xf32>
    %75 = arith.mulf %73, %74 : vector<2x256xf32>
    %c6 = arith.constant 6 : index
    %c0_26 = arith.constant 0 : index
    %c0_27 = arith.constant 0 : index
    %76 = vector.load %arg2[%c6, %c0_26, %c0_27] : memref<9x1x256xf32, #tpu.memory_space<vmem>>, vector<1x1x256xf32>
    %77 = vector.shape_cast %76 : vector<1x1x256xf32> to vector<1x256xf32>
    %78 = vector.broadcast %77 : vector<1x256xf32> to vector<2x256xf32>
    %79 = arith.mulf %75, %78 : vector<2x256xf32>
    %c253_i32 = arith.constant 253 : i32
    %80 = tpu.dynamic_rotate %30 by %c253_i32 dim 1 : vector<2x256xf32>, i32 -> vector<2x256xf32>
    %81 = vector.broadcast %16 : vector<1x256xf32> to vector<2x256xf32>
    %82 = arith.mulf %80, %81 : vector<2x256xf32>
    %c7 = arith.constant 7 : index
    %c0_28 = arith.constant 0 : index
    %c0_29 = arith.constant 0 : index
    %83 = vector.load %arg2[%c7, %c0_28, %c0_29] : memref<9x1x256xf32, #tpu.memory_space<vmem>>, vector<1x1x256xf32>
    %84 = vector.shape_cast %83 : vector<1x1x256xf32> to vector<1x256xf32>
    %85 = vector.broadcast %84 : vector<1x256xf32> to vector<2x256xf32>
    %86 = arith.mulf %82, %85 : vector<2x256xf32>
    %c205_i32 = arith.constant 205 : i32
    %87 = tpu.dynamic_rotate %30 by %c205_i32 dim 1 : vector<2x256xf32>, i32 -> vector<2x256xf32>
    %88 = vector.broadcast %16 : vector<1x256xf32> to vector<2x256xf32>
    %89 = arith.mulf %87, %88 : vector<2x256xf32>
    %c8 = arith.constant 8 : index
    %c0_30 = arith.constant 0 : index
    %c0_31 = arith.constant 0 : index
    %90 = vector.load %arg2[%c8, %c0_30, %c0_31] : memref<9x1x256xf32, #tpu.memory_space<vmem>>, vector<1x1x256xf32>
    %91 = vector.shape_cast %90 : vector<1x1x256xf32> to vector<1x256xf32>
    %92 = vector.broadcast %91 : vector<1x256xf32> to vector<2x256xf32>
    %93 = arith.mulf %89, %92 : vector<2x256xf32>
    %94 = arith.maximumf %38, %45 : vector<2x256xf32>
    %95 = arith.maximumf %94, %52 : vector<2x256xf32>
    %96 = arith.maximumf %95, %59 : vector<2x256xf32>
    %97 = arith.maximumf %96, %65 : vector<2x256xf32>
    %98 = arith.maximumf %97, %72 : vector<2x256xf32>
    %99 = arith.maximumf %98, %79 : vector<2x256xf32>
    %100 = arith.maximumf %99, %86 : vector<2x256xf32>
    %101 = arith.maximumf %100, %93 : vector<2x256xf32>
    %cst_32 = arith.constant 0.000000e+00 : f32
    %102 = vector.broadcast %cst_32 : f32 to vector<2x256xf32>
    %cst_33 = arith.constant 0.000000e+00 : f32
    %103 = vector.broadcast %cst_33 : f32 to vector<8x256xf32>
    %cst_34 = arith.constant 0.000000e+00 : f32
    %104 = vector.broadcast %cst_34 : f32 to vector<8x256xf32>
    %105 = arith.subf %38, %101 : vector<2x256xf32>
    %106 = math.exp %105 : vector<2x256xf32>
    %107 = arith.addf %102, %106 : vector<2x256xf32>
    %c0_35 = arith.constant 0 : index
    %c0_36 = arith.constant 0 : index
    %c0_37 = arith.constant 0 : index
    %108 = vector.load %arg2[%c0_35, %c0_36, %c0_37] : memref<9x1x256xf32, #tpu.memory_space<vmem>>, vector<1x1x256xf32>
    %109 = vector.shape_cast %108 : vector<1x1x256xf32> to vector<1x256xf32>
    %110 = vector.broadcast %109 : vector<1x256xf32> to vector<2x256xf32>
    %111 = arith.mulf %106, %110 : vector<2x256xf32>
    %c51_i32_38 = arith.constant 51 : i32
    %112 = tpu.dynamic_rotate %31 by %c51_i32_38 dim 1 : vector<16x256xf32>, i32 -> vector<16x256xf32>
    %113 = vector.extract_strided_slice %111 {offsets = [0, 0], sizes = [1, 256], strides = [1, 1]} : vector<2x256xf32> to vector<1x256xf32>
    %114 = vector.extract_strided_slice %112 {offsets = [0, 0], sizes = [8, 256], strides = [1, 1]} : vector<16x256xf32> to vector<8x256xf32>
    %115 = vector.broadcast %113 : vector<1x256xf32> to vector<8x256xf32>
    %116 = arith.mulf %115, %114 : vector<8x256xf32>
    %117 = arith.addf %103, %116 : vector<8x256xf32>
    %118 = vector.extract_strided_slice %111 {offsets = [1, 0], sizes = [1, 256], strides = [1, 1]} : vector<2x256xf32> to vector<1x256xf32>
    %119 = vector.extract_strided_slice %112 {offsets = [8, 0], sizes = [8, 256], strides = [1, 1]} : vector<16x256xf32> to vector<8x256xf32>
    %120 = vector.broadcast %118 : vector<1x256xf32> to vector<8x256xf32>
    %121 = arith.mulf %120, %119 : vector<8x256xf32>
    %122 = arith.addf %104, %121 : vector<8x256xf32>
    %123 = arith.subf %45, %101 : vector<2x256xf32>
    %124 = math.exp %123 : vector<2x256xf32>
    %125 = arith.addf %107, %124 : vector<2x256xf32>
    %c1_39 = arith.constant 1 : index
    %c0_40 = arith.constant 0 : index
    %c0_41 = arith.constant 0 : index
    %126 = vector.load %arg2[%c1_39, %c0_40, %c0_41] : memref<9x1x256xf32, #tpu.memory_space<vmem>>, vector<1x1x256xf32>
    %127 = vector.shape_cast %126 : vector<1x1x256xf32> to vector<1x256xf32>
    %128 = vector.broadcast %127 : vector<1x256xf32> to vector<2x256xf32>
    %129 = arith.mulf %124, %128 : vector<2x256xf32>
    %c3_i32_42 = arith.constant 3 : i32
    %130 = tpu.dynamic_rotate %31 by %c3_i32_42 dim 1 : vector<16x256xf32>, i32 -> vector<16x256xf32>
    %131 = vector.extract_strided_slice %129 {offsets = [0, 0], sizes = [1, 256], strides = [1, 1]} : vector<2x256xf32> to vector<1x256xf32>
    %132 = vector.extract_strided_slice %130 {offsets = [0, 0], sizes = [8, 256], strides = [1, 1]} : vector<16x256xf32> to vector<8x256xf32>
    %133 = vector.broadcast %131 : vector<1x256xf32> to vector<8x256xf32>
    %134 = arith.mulf %133, %132 : vector<8x256xf32>
    %135 = arith.addf %117, %134 : vector<8x256xf32>
    %136 = vector.extract_strided_slice %129 {offsets = [1, 0], sizes = [1, 256], strides = [1, 1]} : vector<2x256xf32> to vector<1x256xf32>
    %137 = vector.extract_strided_slice %130 {offsets = [8, 0], sizes = [8, 256], strides = [1, 1]} : vector<16x256xf32> to vector<8x256xf32>
    %138 = vector.broadcast %136 : vector<1x256xf32> to vector<8x256xf32>
    %139 = arith.mulf %138, %137 : vector<8x256xf32>
    %140 = arith.addf %122, %139 : vector<8x256xf32>
    %141 = arith.subf %52, %101 : vector<2x256xf32>
    %142 = math.exp %141 : vector<2x256xf32>
    %143 = arith.addf %125, %142 : vector<2x256xf32>
    %c2_43 = arith.constant 2 : index
    %c0_44 = arith.constant 0 : index
    %c0_45 = arith.constant 0 : index
    %144 = vector.load %arg2[%c2_43, %c0_44, %c0_45] : memref<9x1x256xf32, #tpu.memory_space<vmem>>, vector<1x1x256xf32>
    %145 = vector.shape_cast %144 : vector<1x1x256xf32> to vector<1x256xf32>
    %146 = vector.broadcast %145 : vector<1x256xf32> to vector<2x256xf32>
    %147 = arith.mulf %142, %146 : vector<2x256xf32>
    %c211_i32_46 = arith.constant 211 : i32
    %148 = tpu.dynamic_rotate %31 by %c211_i32_46 dim 1 : vector<16x256xf32>, i32 -> vector<16x256xf32>
    %149 = vector.extract_strided_slice %147 {offsets = [0, 0], sizes = [1, 256], strides = [1, 1]} : vector<2x256xf32> to vector<1x256xf32>
    %150 = vector.extract_strided_slice %148 {offsets = [0, 0], sizes = [8, 256], strides = [1, 1]} : vector<16x256xf32> to vector<8x256xf32>
    %151 = vector.broadcast %149 : vector<1x256xf32> to vector<8x256xf32>
    %152 = arith.mulf %151, %150 : vector<8x256xf32>
    %153 = arith.addf %135, %152 : vector<8x256xf32>
    %154 = vector.extract_strided_slice %147 {offsets = [1, 0], sizes = [1, 256], strides = [1, 1]} : vector<2x256xf32> to vector<1x256xf32>
    %155 = vector.extract_strided_slice %148 {offsets = [8, 0], sizes = [8, 256], strides = [1, 1]} : vector<16x256xf32> to vector<8x256xf32>
    %156 = vector.broadcast %154 : vector<1x256xf32> to vector<8x256xf32>
    %157 = arith.mulf %156, %155 : vector<8x256xf32>
    %158 = arith.addf %140, %157 : vector<8x256xf32>
    %159 = arith.subf %59, %101 : vector<2x256xf32>
    %160 = math.exp %159 : vector<2x256xf32>
    %161 = arith.addf %143, %160 : vector<2x256xf32>
    %c3_47 = arith.constant 3 : index
    %c0_48 = arith.constant 0 : index
    %c0_49 = arith.constant 0 : index
    %162 = vector.load %arg2[%c3_47, %c0_48, %c0_49] : memref<9x1x256xf32, #tpu.memory_space<vmem>>, vector<1x1x256xf32>
    %163 = vector.shape_cast %162 : vector<1x1x256xf32> to vector<1x256xf32>
    %164 = vector.broadcast %163 : vector<1x256xf32> to vector<2x256xf32>
    %165 = arith.mulf %160, %164 : vector<2x256xf32>
    %c48_i32_50 = arith.constant 48 : i32
    %166 = tpu.dynamic_rotate %31 by %c48_i32_50 dim 1 : vector<16x256xf32>, i32 -> vector<16x256xf32>
    %167 = vector.extract_strided_slice %165 {offsets = [0, 0], sizes = [1, 256], strides = [1, 1]} : vector<2x256xf32> to vector<1x256xf32>
    %168 = vector.extract_strided_slice %166 {offsets = [0, 0], sizes = [8, 256], strides = [1, 1]} : vector<16x256xf32> to vector<8x256xf32>
    %169 = vector.broadcast %167 : vector<1x256xf32> to vector<8x256xf32>
    %170 = arith.mulf %169, %168 : vector<8x256xf32>
    %171 = arith.addf %153, %170 : vector<8x256xf32>
    %172 = vector.extract_strided_slice %165 {offsets = [1, 0], sizes = [1, 256], strides = [1, 1]} : vector<2x256xf32> to vector<1x256xf32>
    %173 = vector.extract_strided_slice %166 {offsets = [8, 0], sizes = [8, 256], strides = [1, 1]} : vector<16x256xf32> to vector<8x256xf32>
    %174 = vector.broadcast %172 : vector<1x256xf32> to vector<8x256xf32>
    %175 = arith.mulf %174, %173 : vector<8x256xf32>
    %176 = arith.addf %158, %175 : vector<8x256xf32>
    %177 = arith.subf %65, %101 : vector<2x256xf32>
    %178 = math.exp %177 : vector<2x256xf32>
    %179 = arith.addf %161, %178 : vector<2x256xf32>
    %c4_51 = arith.constant 4 : index
    %c0_52 = arith.constant 0 : index
    %c0_53 = arith.constant 0 : index
    %180 = vector.load %arg2[%c4_51, %c0_52, %c0_53] : memref<9x1x256xf32, #tpu.memory_space<vmem>>, vector<1x1x256xf32>
    %181 = vector.shape_cast %180 : vector<1x1x256xf32> to vector<1x256xf32>
    %182 = vector.broadcast %181 : vector<1x256xf32> to vector<2x256xf32>
    %183 = arith.mulf %178, %182 : vector<2x256xf32>
    %184 = vector.extract_strided_slice %183 {offsets = [0, 0], sizes = [1, 256], strides = [1, 1]} : vector<2x256xf32> to vector<1x256xf32>
    %185 = vector.extract_strided_slice %31 {offsets = [0, 0], sizes = [8, 256], strides = [1, 1]} : vector<16x256xf32> to vector<8x256xf32>
    %186 = vector.broadcast %184 : vector<1x256xf32> to vector<8x256xf32>
    %187 = arith.mulf %186, %185 : vector<8x256xf32>
    %188 = arith.addf %171, %187 : vector<8x256xf32>
    %189 = vector.extract_strided_slice %183 {offsets = [1, 0], sizes = [1, 256], strides = [1, 1]} : vector<2x256xf32> to vector<1x256xf32>
    %190 = vector.extract_strided_slice %31 {offsets = [8, 0], sizes = [8, 256], strides = [1, 1]} : vector<16x256xf32> to vector<8x256xf32>
    %191 = vector.broadcast %189 : vector<1x256xf32> to vector<8x256xf32>
    %192 = arith.mulf %191, %190 : vector<8x256xf32>
    %193 = arith.addf %176, %192 : vector<8x256xf32>
    %194 = arith.subf %72, %101 : vector<2x256xf32>
    %195 = math.exp %194 : vector<2x256xf32>
    %196 = arith.addf %179, %195 : vector<2x256xf32>
    %c5_54 = arith.constant 5 : index
    %c0_55 = arith.constant 0 : index
    %c0_56 = arith.constant 0 : index
    %197 = vector.load %arg2[%c5_54, %c0_55, %c0_56] : memref<9x1x256xf32, #tpu.memory_space<vmem>>, vector<1x1x256xf32>
    %198 = vector.shape_cast %197 : vector<1x1x256xf32> to vector<1x256xf32>
    %199 = vector.broadcast %198 : vector<1x256xf32> to vector<2x256xf32>
    %200 = arith.mulf %195, %199 : vector<2x256xf32>
    %c208_i32_57 = arith.constant 208 : i32
    %201 = tpu.dynamic_rotate %31 by %c208_i32_57 dim 1 : vector<16x256xf32>, i32 -> vector<16x256xf32>
    %202 = vector.extract_strided_slice %200 {offsets = [0, 0], sizes = [1, 256], strides = [1, 1]} : vector<2x256xf32> to vector<1x256xf32>
    %203 = vector.extract_strided_slice %201 {offsets = [0, 0], sizes = [8, 256], strides = [1, 1]} : vector<16x256xf32> to vector<8x256xf32>
    %204 = vector.broadcast %202 : vector<1x256xf32> to vector<8x256xf32>
    %205 = arith.mulf %204, %203 : vector<8x256xf32>
    %206 = arith.addf %188, %205 : vector<8x256xf32>
    %207 = vector.extract_strided_slice %200 {offsets = [1, 0], sizes = [1, 256], strides = [1, 1]} : vector<2x256xf32> to vector<1x256xf32>
    %208 = vector.extract_strided_slice %201 {offsets = [8, 0], sizes = [8, 256], strides = [1, 1]} : vector<16x256xf32> to vector<8x256xf32>
    %209 = vector.broadcast %207 : vector<1x256xf32> to vector<8x256xf32>
    %210 = arith.mulf %209, %208 : vector<8x256xf32>
    %211 = arith.addf %193, %210 : vector<8x256xf32>
    %212 = arith.subf %79, %101 : vector<2x256xf32>
    %213 = math.exp %212 : vector<2x256xf32>
    %214 = arith.addf %196, %213 : vector<2x256xf32>
    %c6_58 = arith.constant 6 : index
    %c0_59 = arith.constant 0 : index
    %c0_60 = arith.constant 0 : index
    %215 = vector.load %arg2[%c6_58, %c0_59, %c0_60] : memref<9x1x256xf32, #tpu.memory_space<vmem>>, vector<1x1x256xf32>
    %216 = vector.shape_cast %215 : vector<1x1x256xf32> to vector<1x256xf32>
    %217 = vector.broadcast %216 : vector<1x256xf32> to vector<2x256xf32>
    %218 = arith.mulf %213, %217 : vector<2x256xf32>
    %c45_i32_61 = arith.constant 45 : i32
    %219 = tpu.dynamic_rotate %31 by %c45_i32_61 dim 1 : vector<16x256xf32>, i32 -> vector<16x256xf32>
    %220 = vector.extract_strided_slice %218 {offsets = [0, 0], sizes = [1, 256], strides = [1, 1]} : vector<2x256xf32> to vector<1x256xf32>
    %221 = vector.extract_strided_slice %219 {offsets = [0, 0], sizes = [8, 256], strides = [1, 1]} : vector<16x256xf32> to vector<8x256xf32>
    %222 = vector.broadcast %220 : vector<1x256xf32> to vector<8x256xf32>
    %223 = arith.mulf %222, %221 : vector<8x256xf32>
    %224 = arith.addf %206, %223 : vector<8x256xf32>
    %225 = vector.extract_strided_slice %218 {offsets = [1, 0], sizes = [1, 256], strides = [1, 1]} : vector<2x256xf32> to vector<1x256xf32>
    %226 = vector.extract_strided_slice %219 {offsets = [8, 0], sizes = [8, 256], strides = [1, 1]} : vector<16x256xf32> to vector<8x256xf32>
    %227 = vector.broadcast %225 : vector<1x256xf32> to vector<8x256xf32>
    %228 = arith.mulf %227, %226 : vector<8x256xf32>
    %229 = arith.addf %211, %228 : vector<8x256xf32>
    %230 = arith.subf %86, %101 : vector<2x256xf32>
    %231 = math.exp %230 : vector<2x256xf32>
    %232 = arith.addf %214, %231 : vector<2x256xf32>
    %c7_62 = arith.constant 7 : index
    %c0_63 = arith.constant 0 : index
    %c0_64 = arith.constant 0 : index
    %233 = vector.load %arg2[%c7_62, %c0_63, %c0_64] : memref<9x1x256xf32, #tpu.memory_space<vmem>>, vector<1x1x256xf32>
    %234 = vector.shape_cast %233 : vector<1x1x256xf32> to vector<1x256xf32>
    %235 = vector.broadcast %234 : vector<1x256xf32> to vector<2x256xf32>
    %236 = arith.mulf %231, %235 : vector<2x256xf32>
    %c253_i32_65 = arith.constant 253 : i32
    %237 = tpu.dynamic_rotate %31 by %c253_i32_65 dim 1 : vector<16x256xf32>, i32 -> vector<16x256xf32>
    %238 = vector.extract_strided_slice %236 {offsets = [0, 0], sizes = [1, 256], strides = [1, 1]} : vector<2x256xf32> to vector<1x256xf32>
    %239 = vector.extract_strided_slice %237 {offsets = [0, 0], sizes = [8, 256], strides = [1, 1]} : vector<16x256xf32> to vector<8x256xf32>
    %240 = vector.broadcast %238 : vector<1x256xf32> to vector<8x256xf32>
    %241 = arith.mulf %240, %239 : vector<8x256xf32>
    %242 = arith.addf %224, %241 : vector<8x256xf32>
    %243 = vector.extract_strided_slice %236 {offsets = [1, 0], sizes = [1, 256], strides = [1, 1]} : vector<2x256xf32> to vector<1x256xf32>
    %244 = vector.extract_strided_slice %237 {offsets = [8, 0], sizes = [8, 256], strides = [1, 1]} : vector<16x256xf32> to vector<8x256xf32>
    %245 = vector.broadcast %243 : vector<1x256xf32> to vector<8x256xf32>
    %246 = arith.mulf %245, %244 : vector<8x256xf32>
    %247 = arith.addf %229, %246 : vector<8x256xf32>
    %248 = arith.subf %93, %101 : vector<2x256xf32>
    %249 = math.exp %248 : vector<2x256xf32>
    %250 = arith.addf %232, %249 : vector<2x256xf32>
    %c8_66 = arith.constant 8 : index
    %c0_67 = arith.constant 0 : index
    %c0_68 = arith.constant 0 : index
    %251 = vector.load %arg2[%c8_66, %c0_67, %c0_68] : memref<9x1x256xf32, #tpu.memory_space<vmem>>, vector<1x1x256xf32>
    %252 = vector.shape_cast %251 : vector<1x1x256xf32> to vector<1x256xf32>
    %253 = vector.broadcast %252 : vector<1x256xf32> to vector<2x256xf32>
    %254 = arith.mulf %249, %253 : vector<2x256xf32>
    %c205_i32_69 = arith.constant 205 : i32
    %255 = tpu.dynamic_rotate %31 by %c205_i32_69 dim 1 : vector<16x256xf32>, i32 -> vector<16x256xf32>
    %256 = vector.extract_strided_slice %254 {offsets = [0, 0], sizes = [1, 256], strides = [1, 1]} : vector<2x256xf32> to vector<1x256xf32>
    %257 = vector.extract_strided_slice %255 {offsets = [0, 0], sizes = [8, 256], strides = [1, 1]} : vector<16x256xf32> to vector<8x256xf32>
    %258 = vector.broadcast %256 : vector<1x256xf32> to vector<8x256xf32>
    %259 = arith.mulf %258, %257 : vector<8x256xf32>
    %260 = arith.addf %242, %259 : vector<8x256xf32>
    %261 = vector.extract_strided_slice %254 {offsets = [1, 0], sizes = [1, 256], strides = [1, 1]} : vector<2x256xf32> to vector<1x256xf32>
    %262 = vector.extract_strided_slice %255 {offsets = [8, 0], sizes = [8, 256], strides = [1, 1]} : vector<16x256xf32> to vector<8x256xf32>
    %263 = vector.broadcast %261 : vector<1x256xf32> to vector<8x256xf32>
    %264 = arith.mulf %263, %262 : vector<8x256xf32>
    %265 = arith.addf %247, %264 : vector<8x256xf32>
    %266 = tpu.reciprocal %250 : vector<2x256xf32> -> vector<2x256xf32>
    %267 = vector.extract_strided_slice %266 {offsets = [0, 0], sizes = [1, 256], strides = [1, 1]} : vector<2x256xf32> to vector<1x256xf32>
    %268 = vector.broadcast %267 : vector<1x256xf32> to vector<8x256xf32>
    %269 = arith.mulf %260, %268 : vector<8x256xf32>
    %270 = vector.extract_strided_slice %266 {offsets = [1, 0], sizes = [1, 256], strides = [1, 1]} : vector<2x256xf32> to vector<1x256xf32>
    %271 = vector.broadcast %270 : vector<1x256xf32> to vector<8x256xf32>
    %272 = arith.mulf %265, %271 : vector<8x256xf32>
    %c2_70 = arith.constant 2 : index
    %c0_71 = arith.constant 0 : index
    %c0_72 = arith.constant 0 : index
    %273 = vector.load %arg4[%c2_70, %c0_71, %c0_72] : memref<4x8x1xf32, #tpu.memory_space<vmem>>, vector<1x8x1xf32>
    %274 = vector.shape_cast %273 : vector<1x8x1xf32> to vector<8x1xf32>
    %275 = vector.broadcast %274 : vector<8x1xf32> to vector<8x256xf32>
    %276 = arith.mulf %3, %275 : vector<8x256xf32>
    %cst_73 = arith.constant dense<0.000000e+00> : vector<256xf32>
    %277 = vector.multi_reduction <add>, %276, %cst_73 [0] : vector<8x256xf32> to vector<256xf32>
    %278 = vector.shape_cast %277 : vector<256xf32> to vector<1x256xf32>
    %c2_74 = arith.constant 2 : index
    %279 = memref.load %arg5[%c2_74] : memref<4xf32, #tpu.memory_space<smem>>
    %280 = vector.broadcast %279 : f32 to vector<1x256xf32>
    %281 = arith.addf %278, %280 : vector<1x256xf32>
    %c3_75 = arith.constant 3 : index
    %c0_76 = arith.constant 0 : index
    %c0_77 = arith.constant 0 : index
    %282 = vector.load %arg4[%c3_75, %c0_76, %c0_77] : memref<4x8x1xf32, #tpu.memory_space<vmem>>, vector<1x8x1xf32>
    %283 = vector.shape_cast %282 : vector<1x8x1xf32> to vector<8x1xf32>
    %284 = vector.broadcast %283 : vector<8x1xf32> to vector<8x256xf32>
    %285 = arith.mulf %269, %284 : vector<8x256xf32>
    %cst_78 = arith.constant dense<0.000000e+00> : vector<256xf32>
    %286 = vector.multi_reduction <add>, %285, %cst_78 [0] : vector<8x256xf32> to vector<256xf32>
    %287 = vector.shape_cast %286 : vector<256xf32> to vector<1x256xf32>
    %288 = vector.broadcast %283 : vector<8x1xf32> to vector<8x256xf32>
    %289 = arith.mulf %272, %288 : vector<8x256xf32>
    %cst_79 = arith.constant dense<0.000000e+00> : vector<256xf32>
    %290 = vector.multi_reduction <add>, %289, %cst_79 [0] : vector<8x256xf32> to vector<256xf32>
    %291 = vector.shape_cast %290 : vector<256xf32> to vector<1x256xf32>
    %292 = tpu.concatenate %287, %291 in 0 : vector<1x256xf32>, vector<1x256xf32> -> vector<2x256xf32>
    %c3_80 = arith.constant 3 : index
    %293 = memref.load %arg5[%c3_80] : memref<4xf32, #tpu.memory_space<smem>>
    %294 = vector.broadcast %293 : f32 to vector<2x256xf32>
    %295 = arith.addf %292, %294 : vector<2x256xf32>
    %296 = tpu.concatenate %269, %272 in 0 : vector<8x256xf32>, vector<8x256xf32> -> vector<16x256xf32>
    %c17_i32 = arith.constant 17 : i32
    %297 = tpu.dynamic_rotate %295 by %c17_i32 dim 1 : vector<2x256xf32>, i32 -> vector<2x256xf32>
    %298 = vector.broadcast %281 : vector<1x256xf32> to vector<2x256xf32>
    %299 = arith.mulf %297, %298 : vector<2x256xf32>
    %c0_81 = arith.constant 0 : index
    %c0_82 = arith.constant 0 : index
    %c0_83 = arith.constant 0 : index
    %300 = vector.load %arg3[%c0_81, %c0_82, %c0_83] : memref<9x1x256xf32, #tpu.memory_space<vmem>>, vector<1x1x256xf32>
    %301 = vector.shape_cast %300 : vector<1x1x256xf32> to vector<1x256xf32>
    %302 = vector.broadcast %301 : vector<1x256xf32> to vector<2x256xf32>
    %303 = arith.mulf %299, %302 : vector<2x256xf32>
    %c1_i32 = arith.constant 1 : i32
    %304 = tpu.dynamic_rotate %295 by %c1_i32 dim 1 : vector<2x256xf32>, i32 -> vector<2x256xf32>
    %305 = vector.broadcast %281 : vector<1x256xf32> to vector<2x256xf32>
    %306 = arith.mulf %304, %305 : vector<2x256xf32>
    %c1_84 = arith.constant 1 : index
    %c0_85 = arith.constant 0 : index
    %c0_86 = arith.constant 0 : index
    %307 = vector.load %arg3[%c1_84, %c0_85, %c0_86] : memref<9x1x256xf32, #tpu.memory_space<vmem>>, vector<1x1x256xf32>
    %308 = vector.shape_cast %307 : vector<1x1x256xf32> to vector<1x256xf32>
    %309 = vector.broadcast %308 : vector<1x256xf32> to vector<2x256xf32>
    %310 = arith.mulf %306, %309 : vector<2x256xf32>
    %c241_i32 = arith.constant 241 : i32
    %311 = tpu.dynamic_rotate %295 by %c241_i32 dim 1 : vector<2x256xf32>, i32 -> vector<2x256xf32>
    %312 = vector.broadcast %281 : vector<1x256xf32> to vector<2x256xf32>
    %313 = arith.mulf %311, %312 : vector<2x256xf32>
    %c2_87 = arith.constant 2 : index
    %c0_88 = arith.constant 0 : index
    %c0_89 = arith.constant 0 : index
    %314 = vector.load %arg3[%c2_87, %c0_88, %c0_89] : memref<9x1x256xf32, #tpu.memory_space<vmem>>, vector<1x1x256xf32>
    %315 = vector.shape_cast %314 : vector<1x1x256xf32> to vector<1x256xf32>
    %316 = vector.broadcast %315 : vector<1x256xf32> to vector<2x256xf32>
    %317 = arith.mulf %313, %316 : vector<2x256xf32>
    %c16_i32 = arith.constant 16 : i32
    %318 = tpu.dynamic_rotate %295 by %c16_i32 dim 1 : vector<2x256xf32>, i32 -> vector<2x256xf32>
    %319 = vector.broadcast %281 : vector<1x256xf32> to vector<2x256xf32>
    %320 = arith.mulf %318, %319 : vector<2x256xf32>
    %c3_90 = arith.constant 3 : index
    %c0_91 = arith.constant 0 : index
    %c0_92 = arith.constant 0 : index
    %321 = vector.load %arg3[%c3_90, %c0_91, %c0_92] : memref<9x1x256xf32, #tpu.memory_space<vmem>>, vector<1x1x256xf32>
    %322 = vector.shape_cast %321 : vector<1x1x256xf32> to vector<1x256xf32>
    %323 = vector.broadcast %322 : vector<1x256xf32> to vector<2x256xf32>
    %324 = arith.mulf %320, %323 : vector<2x256xf32>
    %325 = vector.broadcast %281 : vector<1x256xf32> to vector<2x256xf32>
    %326 = arith.mulf %295, %325 : vector<2x256xf32>
    %c4_93 = arith.constant 4 : index
    %c0_94 = arith.constant 0 : index
    %c0_95 = arith.constant 0 : index
    %327 = vector.load %arg3[%c4_93, %c0_94, %c0_95] : memref<9x1x256xf32, #tpu.memory_space<vmem>>, vector<1x1x256xf32>
    %328 = vector.shape_cast %327 : vector<1x1x256xf32> to vector<1x256xf32>
    %329 = vector.broadcast %328 : vector<1x256xf32> to vector<2x256xf32>
    %330 = arith.mulf %326, %329 : vector<2x256xf32>
    %c240_i32 = arith.constant 240 : i32
    %331 = tpu.dynamic_rotate %295 by %c240_i32 dim 1 : vector<2x256xf32>, i32 -> vector<2x256xf32>
    %332 = vector.broadcast %281 : vector<1x256xf32> to vector<2x256xf32>
    %333 = arith.mulf %331, %332 : vector<2x256xf32>
    %c5_96 = arith.constant 5 : index
    %c0_97 = arith.constant 0 : index
    %c0_98 = arith.constant 0 : index
    %334 = vector.load %arg3[%c5_96, %c0_97, %c0_98] : memref<9x1x256xf32, #tpu.memory_space<vmem>>, vector<1x1x256xf32>
    %335 = vector.shape_cast %334 : vector<1x1x256xf32> to vector<1x256xf32>
    %336 = vector.broadcast %335 : vector<1x256xf32> to vector<2x256xf32>
    %337 = arith.mulf %333, %336 : vector<2x256xf32>
    %c15_i32 = arith.constant 15 : i32
    %338 = tpu.dynamic_rotate %295 by %c15_i32 dim 1 : vector<2x256xf32>, i32 -> vector<2x256xf32>
    %339 = vector.broadcast %281 : vector<1x256xf32> to vector<2x256xf32>
    %340 = arith.mulf %338, %339 : vector<2x256xf32>
    %c6_99 = arith.constant 6 : index
    %c0_100 = arith.constant 0 : index
    %c0_101 = arith.constant 0 : index
    %341 = vector.load %arg3[%c6_99, %c0_100, %c0_101] : memref<9x1x256xf32, #tpu.memory_space<vmem>>, vector<1x1x256xf32>
    %342 = vector.shape_cast %341 : vector<1x1x256xf32> to vector<1x256xf32>
    %343 = vector.broadcast %342 : vector<1x256xf32> to vector<2x256xf32>
    %344 = arith.mulf %340, %343 : vector<2x256xf32>
    %c255_i32 = arith.constant 255 : i32
    %345 = tpu.dynamic_rotate %295 by %c255_i32 dim 1 : vector<2x256xf32>, i32 -> vector<2x256xf32>
    %346 = vector.broadcast %281 : vector<1x256xf32> to vector<2x256xf32>
    %347 = arith.mulf %345, %346 : vector<2x256xf32>
    %c7_102 = arith.constant 7 : index
    %c0_103 = arith.constant 0 : index
    %c0_104 = arith.constant 0 : index
    %348 = vector.load %arg3[%c7_102, %c0_103, %c0_104] : memref<9x1x256xf32, #tpu.memory_space<vmem>>, vector<1x1x256xf32>
    %349 = vector.shape_cast %348 : vector<1x1x256xf32> to vector<1x256xf32>
    %350 = vector.broadcast %349 : vector<1x256xf32> to vector<2x256xf32>
    %351 = arith.mulf %347, %350 : vector<2x256xf32>
    %c239_i32 = arith.constant 239 : i32
    %352 = tpu.dynamic_rotate %295 by %c239_i32 dim 1 : vector<2x256xf32>, i32 -> vector<2x256xf32>
    %353 = vector.broadcast %281 : vector<1x256xf32> to vector<2x256xf32>
    %354 = arith.mulf %352, %353 : vector<2x256xf32>
    %c8_105 = arith.constant 8 : index
    %c0_106 = arith.constant 0 : index
    %c0_107 = arith.constant 0 : index
    %355 = vector.load %arg3[%c8_105, %c0_106, %c0_107] : memref<9x1x256xf32, #tpu.memory_space<vmem>>, vector<1x1x256xf32>
    %356 = vector.shape_cast %355 : vector<1x1x256xf32> to vector<1x256xf32>
    %357 = vector.broadcast %356 : vector<1x256xf32> to vector<2x256xf32>
    %358 = arith.mulf %354, %357 : vector<2x256xf32>
    %359 = arith.maximumf %303, %310 : vector<2x256xf32>
    %360 = arith.maximumf %359, %317 : vector<2x256xf32>
    %361 = arith.maximumf %360, %324 : vector<2x256xf32>
    %362 = arith.maximumf %361, %330 : vector<2x256xf32>
    %363 = arith.maximumf %362, %337 : vector<2x256xf32>
    %364 = arith.maximumf %363, %344 : vector<2x256xf32>
    %365 = arith.maximumf %364, %351 : vector<2x256xf32>
    %366 = arith.maximumf %365, %358 : vector<2x256xf32>
    %cst_108 = arith.constant 0.000000e+00 : f32
    %367 = vector.broadcast %cst_108 : f32 to vector<2x256xf32>
    %cst_109 = arith.constant 0.000000e+00 : f32
    %368 = vector.broadcast %cst_109 : f32 to vector<8x256xf32>
    %cst_110 = arith.constant 0.000000e+00 : f32
    %369 = vector.broadcast %cst_110 : f32 to vector<8x256xf32>
    %370 = arith.subf %303, %366 : vector<2x256xf32>
    %371 = math.exp %370 : vector<2x256xf32>
    %372 = arith.addf %367, %371 : vector<2x256xf32>
    %c0_111 = arith.constant 0 : index
    %c0_112 = arith.constant 0 : index
    %c0_113 = arith.constant 0 : index
    %373 = vector.load %arg3[%c0_111, %c0_112, %c0_113] : memref<9x1x256xf32, #tpu.memory_space<vmem>>, vector<1x1x256xf32>
    %374 = vector.shape_cast %373 : vector<1x1x256xf32> to vector<1x256xf32>
    %375 = vector.broadcast %374 : vector<1x256xf32> to vector<2x256xf32>
    %376 = arith.mulf %371, %375 : vector<2x256xf32>
    %c17_i32_114 = arith.constant 17 : i32
    %377 = tpu.dynamic_rotate %296 by %c17_i32_114 dim 1 : vector<16x256xf32>, i32 -> vector<16x256xf32>
    %378 = vector.extract_strided_slice %376 {offsets = [0, 0], sizes = [1, 256], strides = [1, 1]} : vector<2x256xf32> to vector<1x256xf32>
    %379 = vector.extract_strided_slice %377 {offsets = [0, 0], sizes = [8, 256], strides = [1, 1]} : vector<16x256xf32> to vector<8x256xf32>
    %380 = vector.broadcast %378 : vector<1x256xf32> to vector<8x256xf32>
    %381 = arith.mulf %380, %379 : vector<8x256xf32>
    %382 = arith.addf %368, %381 : vector<8x256xf32>
    %383 = vector.extract_strided_slice %376 {offsets = [1, 0], sizes = [1, 256], strides = [1, 1]} : vector<2x256xf32> to vector<1x256xf32>
    %384 = vector.extract_strided_slice %377 {offsets = [8, 0], sizes = [8, 256], strides = [1, 1]} : vector<16x256xf32> to vector<8x256xf32>
    %385 = vector.broadcast %383 : vector<1x256xf32> to vector<8x256xf32>
    %386 = arith.mulf %385, %384 : vector<8x256xf32>
    %387 = arith.addf %369, %386 : vector<8x256xf32>
    %388 = arith.subf %310, %366 : vector<2x256xf32>
    %389 = math.exp %388 : vector<2x256xf32>
    %390 = arith.addf %372, %389 : vector<2x256xf32>
    %c1_115 = arith.constant 1 : index
    %c0_116 = arith.constant 0 : index
    %c0_117 = arith.constant 0 : index
    %391 = vector.load %arg3[%c1_115, %c0_116, %c0_117] : memref<9x1x256xf32, #tpu.memory_space<vmem>>, vector<1x1x256xf32>
    %392 = vector.shape_cast %391 : vector<1x1x256xf32> to vector<1x256xf32>
    %393 = vector.broadcast %392 : vector<1x256xf32> to vector<2x256xf32>
    %394 = arith.mulf %389, %393 : vector<2x256xf32>
    %c1_i32_118 = arith.constant 1 : i32
    %395 = tpu.dynamic_rotate %296 by %c1_i32_118 dim 1 : vector<16x256xf32>, i32 -> vector<16x256xf32>
    %396 = vector.extract_strided_slice %394 {offsets = [0, 0], sizes = [1, 256], strides = [1, 1]} : vector<2x256xf32> to vector<1x256xf32>
    %397 = vector.extract_strided_slice %395 {offsets = [0, 0], sizes = [8, 256], strides = [1, 1]} : vector<16x256xf32> to vector<8x256xf32>
    %398 = vector.broadcast %396 : vector<1x256xf32> to vector<8x256xf32>
    %399 = arith.mulf %398, %397 : vector<8x256xf32>
    %400 = arith.addf %382, %399 : vector<8x256xf32>
    %401 = vector.extract_strided_slice %394 {offsets = [1, 0], sizes = [1, 256], strides = [1, 1]} : vector<2x256xf32> to vector<1x256xf32>
    %402 = vector.extract_strided_slice %395 {offsets = [8, 0], sizes = [8, 256], strides = [1, 1]} : vector<16x256xf32> to vector<8x256xf32>
    %403 = vector.broadcast %401 : vector<1x256xf32> to vector<8x256xf32>
    %404 = arith.mulf %403, %402 : vector<8x256xf32>
    %405 = arith.addf %387, %404 : vector<8x256xf32>
    %406 = arith.subf %317, %366 : vector<2x256xf32>
    %407 = math.exp %406 : vector<2x256xf32>
    %408 = arith.addf %390, %407 : vector<2x256xf32>
    %c2_119 = arith.constant 2 : index
    %c0_120 = arith.constant 0 : index
    %c0_121 = arith.constant 0 : index
    %409 = vector.load %arg3[%c2_119, %c0_120, %c0_121] : memref<9x1x256xf32, #tpu.memory_space<vmem>>, vector<1x1x256xf32>
    %410 = vector.shape_cast %409 : vector<1x1x256xf32> to vector<1x256xf32>
    %411 = vector.broadcast %410 : vector<1x256xf32> to vector<2x256xf32>
    %412 = arith.mulf %407, %411 : vector<2x256xf32>
    %c241_i32_122 = arith.constant 241 : i32
    %413 = tpu.dynamic_rotate %296 by %c241_i32_122 dim 1 : vector<16x256xf32>, i32 -> vector<16x256xf32>
    %414 = vector.extract_strided_slice %412 {offsets = [0, 0], sizes = [1, 256], strides = [1, 1]} : vector<2x256xf32> to vector<1x256xf32>
    %415 = vector.extract_strided_slice %413 {offsets = [0, 0], sizes = [8, 256], strides = [1, 1]} : vector<16x256xf32> to vector<8x256xf32>
    %416 = vector.broadcast %414 : vector<1x256xf32> to vector<8x256xf32>
    %417 = arith.mulf %416, %415 : vector<8x256xf32>
    %418 = arith.addf %400, %417 : vector<8x256xf32>
    %419 = vector.extract_strided_slice %412 {offsets = [1, 0], sizes = [1, 256], strides = [1, 1]} : vector<2x256xf32> to vector<1x256xf32>
    %420 = vector.extract_strided_slice %413 {offsets = [8, 0], sizes = [8, 256], strides = [1, 1]} : vector<16x256xf32> to vector<8x256xf32>
    %421 = vector.broadcast %419 : vector<1x256xf32> to vector<8x256xf32>
    %422 = arith.mulf %421, %420 : vector<8x256xf32>
    %423 = arith.addf %405, %422 : vector<8x256xf32>
    %424 = arith.subf %324, %366 : vector<2x256xf32>
    %425 = math.exp %424 : vector<2x256xf32>
    %426 = arith.addf %408, %425 : vector<2x256xf32>
    %c3_123 = arith.constant 3 : index
    %c0_124 = arith.constant 0 : index
    %c0_125 = arith.constant 0 : index
    %427 = vector.load %arg3[%c3_123, %c0_124, %c0_125] : memref<9x1x256xf32, #tpu.memory_space<vmem>>, vector<1x1x256xf32>
    %428 = vector.shape_cast %427 : vector<1x1x256xf32> to vector<1x256xf32>
    %429 = vector.broadcast %428 : vector<1x256xf32> to vector<2x256xf32>
    %430 = arith.mulf %425, %429 : vector<2x256xf32>
    %c16_i32_126 = arith.constant 16 : i32
    %431 = tpu.dynamic_rotate %296 by %c16_i32_126 dim 1 : vector<16x256xf32>, i32 -> vector<16x256xf32>
    %432 = vector.extract_strided_slice %430 {offsets = [0, 0], sizes = [1, 256], strides = [1, 1]} : vector<2x256xf32> to vector<1x256xf32>
    %433 = vector.extract_strided_slice %431 {offsets = [0, 0], sizes = [8, 256], strides = [1, 1]} : vector<16x256xf32> to vector<8x256xf32>
    %434 = vector.broadcast %432 : vector<1x256xf32> to vector<8x256xf32>
    %435 = arith.mulf %434, %433 : vector<8x256xf32>
    %436 = arith.addf %418, %435 : vector<8x256xf32>
    %437 = vector.extract_strided_slice %430 {offsets = [1, 0], sizes = [1, 256], strides = [1, 1]} : vector<2x256xf32> to vector<1x256xf32>
    %438 = vector.extract_strided_slice %431 {offsets = [8, 0], sizes = [8, 256], strides = [1, 1]} : vector<16x256xf32> to vector<8x256xf32>
    %439 = vector.broadcast %437 : vector<1x256xf32> to vector<8x256xf32>
    %440 = arith.mulf %439, %438 : vector<8x256xf32>
    %441 = arith.addf %423, %440 : vector<8x256xf32>
    %442 = arith.subf %330, %366 : vector<2x256xf32>
    %443 = math.exp %442 : vector<2x256xf32>
    %444 = arith.addf %426, %443 : vector<2x256xf32>
    %c4_127 = arith.constant 4 : index
    %c0_128 = arith.constant 0 : index
    %c0_129 = arith.constant 0 : index
    %445 = vector.load %arg3[%c4_127, %c0_128, %c0_129] : memref<9x1x256xf32, #tpu.memory_space<vmem>>, vector<1x1x256xf32>
    %446 = vector.shape_cast %445 : vector<1x1x256xf32> to vector<1x256xf32>
    %447 = vector.broadcast %446 : vector<1x256xf32> to vector<2x256xf32>
    %448 = arith.mulf %443, %447 : vector<2x256xf32>
    %449 = vector.extract_strided_slice %448 {offsets = [0, 0], sizes = [1, 256], strides = [1, 1]} : vector<2x256xf32> to vector<1x256xf32>
    %450 = vector.extract_strided_slice %296 {offsets = [0, 0], sizes = [8, 256], strides = [1, 1]} : vector<16x256xf32> to vector<8x256xf32>
    %451 = vector.broadcast %449 : vector<1x256xf32> to vector<8x256xf32>
    %452 = arith.mulf %451, %450 : vector<8x256xf32>
    %453 = arith.addf %436, %452 : vector<8x256xf32>
    %454 = vector.extract_strided_slice %448 {offsets = [1, 0], sizes = [1, 256], strides = [1, 1]} : vector<2x256xf32> to vector<1x256xf32>
    %455 = vector.extract_strided_slice %296 {offsets = [8, 0], sizes = [8, 256], strides = [1, 1]} : vector<16x256xf32> to vector<8x256xf32>
    %456 = vector.broadcast %454 : vector<1x256xf32> to vector<8x256xf32>
    %457 = arith.mulf %456, %455 : vector<8x256xf32>
    %458 = arith.addf %441, %457 : vector<8x256xf32>
    %459 = arith.subf %337, %366 : vector<2x256xf32>
    %460 = math.exp %459 : vector<2x256xf32>
    %461 = arith.addf %444, %460 : vector<2x256xf32>
    %c5_130 = arith.constant 5 : index
    %c0_131 = arith.constant 0 : index
    %c0_132 = arith.constant 0 : index
    %462 = vector.load %arg3[%c5_130, %c0_131, %c0_132] : memref<9x1x256xf32, #tpu.memory_space<vmem>>, vector<1x1x256xf32>
    %463 = vector.shape_cast %462 : vector<1x1x256xf32> to vector<1x256xf32>
    %464 = vector.broadcast %463 : vector<1x256xf32> to vector<2x256xf32>
    %465 = arith.mulf %460, %464 : vector<2x256xf32>
    %c240_i32_133 = arith.constant 240 : i32
    %466 = tpu.dynamic_rotate %296 by %c240_i32_133 dim 1 : vector<16x256xf32>, i32 -> vector<16x256xf32>
    %467 = vector.extract_strided_slice %465 {offsets = [0, 0], sizes = [1, 256], strides = [1, 1]} : vector<2x256xf32> to vector<1x256xf32>
    %468 = vector.extract_strided_slice %466 {offsets = [0, 0], sizes = [8, 256], strides = [1, 1]} : vector<16x256xf32> to vector<8x256xf32>
    %469 = vector.broadcast %467 : vector<1x256xf32> to vector<8x256xf32>
    %470 = arith.mulf %469, %468 : vector<8x256xf32>
    %471 = arith.addf %453, %470 : vector<8x256xf32>
    %472 = vector.extract_strided_slice %465 {offsets = [1, 0], sizes = [1, 256], strides = [1, 1]} : vector<2x256xf32> to vector<1x256xf32>
    %473 = vector.extract_strided_slice %466 {offsets = [8, 0], sizes = [8, 256], strides = [1, 1]} : vector<16x256xf32> to vector<8x256xf32>
    %474 = vector.broadcast %472 : vector<1x256xf32> to vector<8x256xf32>
    %475 = arith.mulf %474, %473 : vector<8x256xf32>
    %476 = arith.addf %458, %475 : vector<8x256xf32>
    %477 = arith.subf %344, %366 : vector<2x256xf32>
    %478 = math.exp %477 : vector<2x256xf32>
    %479 = arith.addf %461, %478 : vector<2x256xf32>
    %c6_134 = arith.constant 6 : index
    %c0_135 = arith.constant 0 : index
    %c0_136 = arith.constant 0 : index
    %480 = vector.load %arg3[%c6_134, %c0_135, %c0_136] : memref<9x1x256xf32, #tpu.memory_space<vmem>>, vector<1x1x256xf32>
    %481 = vector.shape_cast %480 : vector<1x1x256xf32> to vector<1x256xf32>
    %482 = vector.broadcast %481 : vector<1x256xf32> to vector<2x256xf32>
    %483 = arith.mulf %478, %482 : vector<2x256xf32>
    %c15_i32_137 = arith.constant 15 : i32
    %484 = tpu.dynamic_rotate %296 by %c15_i32_137 dim 1 : vector<16x256xf32>, i32 -> vector<16x256xf32>
    %485 = vector.extract_strided_slice %483 {offsets = [0, 0], sizes = [1, 256], strides = [1, 1]} : vector<2x256xf32> to vector<1x256xf32>
    %486 = vector.extract_strided_slice %484 {offsets = [0, 0], sizes = [8, 256], strides = [1, 1]} : vector<16x256xf32> to vector<8x256xf32>
    %487 = vector.broadcast %485 : vector<1x256xf32> to vector<8x256xf32>
    %488 = arith.mulf %487, %486 : vector<8x256xf32>
    %489 = arith.addf %471, %488 : vector<8x256xf32>
    %490 = vector.extract_strided_slice %483 {offsets = [1, 0], sizes = [1, 256], strides = [1, 1]} : vector<2x256xf32> to vector<1x256xf32>
    %491 = vector.extract_strided_slice %484 {offsets = [8, 0], sizes = [8, 256], strides = [1, 1]} : vector<16x256xf32> to vector<8x256xf32>
    %492 = vector.broadcast %490 : vector<1x256xf32> to vector<8x256xf32>
    %493 = arith.mulf %492, %491 : vector<8x256xf32>
    %494 = arith.addf %476, %493 : vector<8x256xf32>
    %495 = arith.subf %351, %366 : vector<2x256xf32>
    %496 = math.exp %495 : vector<2x256xf32>
    %497 = arith.addf %479, %496 : vector<2x256xf32>
    %c7_138 = arith.constant 7 : index
    %c0_139 = arith.constant 0 : index
    %c0_140 = arith.constant 0 : index
    %498 = vector.load %arg3[%c7_138, %c0_139, %c0_140] : memref<9x1x256xf32, #tpu.memory_space<vmem>>, vector<1x1x256xf32>
    %499 = vector.shape_cast %498 : vector<1x1x256xf32> to vector<1x256xf32>
    %500 = vector.broadcast %499 : vector<1x256xf32> to vector<2x256xf32>
    %501 = arith.mulf %496, %500 : vector<2x256xf32>
    %c255_i32_141 = arith.constant 255 : i32
    %502 = tpu.dynamic_rotate %296 by %c255_i32_141 dim 1 : vector<16x256xf32>, i32 -> vector<16x256xf32>
    %503 = vector.extract_strided_slice %501 {offsets = [0, 0], sizes = [1, 256], strides = [1, 1]} : vector<2x256xf32> to vector<1x256xf32>
    %504 = vector.extract_strided_slice %502 {offsets = [0, 0], sizes = [8, 256], strides = [1, 1]} : vector<16x256xf32> to vector<8x256xf32>
    %505 = vector.broadcast %503 : vector<1x256xf32> to vector<8x256xf32>
    %506 = arith.mulf %505, %504 : vector<8x256xf32>
    %507 = arith.addf %489, %506 : vector<8x256xf32>
    %508 = vector.extract_strided_slice %501 {offsets = [1, 0], sizes = [1, 256], strides = [1, 1]} : vector<2x256xf32> to vector<1x256xf32>
    %509 = vector.extract_strided_slice %502 {offsets = [8, 0], sizes = [8, 256], strides = [1, 1]} : vector<16x256xf32> to vector<8x256xf32>
    %510 = vector.broadcast %508 : vector<1x256xf32> to vector<8x256xf32>
    %511 = arith.mulf %510, %509 : vector<8x256xf32>
    %512 = arith.addf %494, %511 : vector<8x256xf32>
    %513 = arith.subf %358, %366 : vector<2x256xf32>
    %514 = math.exp %513 : vector<2x256xf32>
    %515 = arith.addf %497, %514 : vector<2x256xf32>
    %c8_142 = arith.constant 8 : index
    %c0_143 = arith.constant 0 : index
    %c0_144 = arith.constant 0 : index
    %516 = vector.load %arg3[%c8_142, %c0_143, %c0_144] : memref<9x1x256xf32, #tpu.memory_space<vmem>>, vector<1x1x256xf32>
    %517 = vector.shape_cast %516 : vector<1x1x256xf32> to vector<1x256xf32>
    %518 = vector.broadcast %517 : vector<1x256xf32> to vector<2x256xf32>
    %519 = arith.mulf %514, %518 : vector<2x256xf32>
    %c239_i32_145 = arith.constant 239 : i32
    %520 = tpu.dynamic_rotate %296 by %c239_i32_145 dim 1 : vector<16x256xf32>, i32 -> vector<16x256xf32>
    %521 = vector.extract_strided_slice %519 {offsets = [0, 0], sizes = [1, 256], strides = [1, 1]} : vector<2x256xf32> to vector<1x256xf32>
    %522 = vector.extract_strided_slice %520 {offsets = [0, 0], sizes = [8, 256], strides = [1, 1]} : vector<16x256xf32> to vector<8x256xf32>
    %523 = vector.broadcast %521 : vector<1x256xf32> to vector<8x256xf32>
    %524 = arith.mulf %523, %522 : vector<8x256xf32>
    %525 = arith.addf %507, %524 : vector<8x256xf32>
    %526 = vector.extract_strided_slice %519 {offsets = [1, 0], sizes = [1, 256], strides = [1, 1]} : vector<2x256xf32> to vector<1x256xf32>
    %527 = vector.extract_strided_slice %520 {offsets = [8, 0], sizes = [8, 256], strides = [1, 1]} : vector<16x256xf32> to vector<8x256xf32>
    %528 = vector.broadcast %526 : vector<1x256xf32> to vector<8x256xf32>
    %529 = arith.mulf %528, %527 : vector<8x256xf32>
    %530 = arith.addf %512, %529 : vector<8x256xf32>
    %531 = tpu.reciprocal %515 : vector<2x256xf32> -> vector<2x256xf32>
    %532 = vector.extract_strided_slice %531 {offsets = [0, 0], sizes = [1, 256], strides = [1, 1]} : vector<2x256xf32> to vector<1x256xf32>
    %533 = vector.broadcast %532 : vector<1x256xf32> to vector<8x256xf32>
    %534 = arith.mulf %525, %533 : vector<8x256xf32>
    %535 = vector.extract_strided_slice %531 {offsets = [1, 0], sizes = [1, 256], strides = [1, 1]} : vector<2x256xf32> to vector<1x256xf32>
    %536 = vector.broadcast %535 : vector<1x256xf32> to vector<8x256xf32>
    %537 = arith.mulf %530, %536 : vector<8x256xf32>
    %538 = vector.shape_cast %534 : vector<8x256xf32> to vector<1x8x256xf32>
    %539 = vector.shape_cast %537 : vector<8x256xf32> to vector<1x8x256xf32>
    %540 = tpu.concatenate %538, %539 in 0 : vector<1x8x256xf32>, vector<1x8x256xf32> -> vector<2x8x256xf32>
    %c0_146 = arith.constant 0 : index
    %c0_147 = arith.constant 0 : index
    %c0_148 = arith.constant 0 : index
    %c0_149 = arith.constant 0 : index
    %541 = vector.load %arg6[%c0_146, %c0_147, %c0_148, %c0_149] : memref<1x2x8x256xf32, #tpu.memory_space<vmem>>, vector<1x2x8x256xf32>
    %542 = vector.shape_cast %541 : vector<1x2x8x256xf32> to vector<2x8x256xf32>
    %543 = vector.shape_cast %540 : vector<2x8x256xf32> to vector<1x2x8x256xf32>
    tpu.vector_store %arg6[%c0_146, %c0_147, %c0_148, %c0_149], %543 {strides = array<i32>} : memref<1x2x8x256xf32, #tpu.memory_space<vmem>>, vector<1x2x8x256xf32>,
    return
  }
  func.func @transform_0(%arg0: i32) -> (i32, i32, i32, i32) {
    %c0_i32 = arith.constant 0 : i32
    %c0_i32_0 = arith.constant 0 : i32
    %c0_i32_1 = arith.constant 0 : i32
    %c0_i32_2 = arith.constant 0 : i32
    return %arg0, %c0_i32, %c0_i32_0, %c0_i32_1 : i32, i32, i32, i32
  }
  func.func @transform_1(%arg0: i32) -> (i32, i32, i32) {
    %c0_i32 = arith.constant 0 : i32
    %c0_i32_0 = arith.constant 0 : i32
    %c0_i32_1 = arith.constant 0 : i32
    %c0_i32_2 = arith.constant 0 : i32
    return %c0_i32, %c0_i32_0, %c0_i32_1 : i32, i32, i32
  }
  func.func @transform_2(%arg0: i32) -> (i32, i32, i32) {
    %c0_i32 = arith.constant 0 : i32
    %c0_i32_0 = arith.constant 0 : i32
    %c0_i32_1 = arith.constant 0 : i32
    %c0_i32_2 = arith.constant 0 : i32
    return %c0_i32, %c0_i32_0, %c0_i32_1 : i32, i32, i32
  }
  func.func @transform_3(%arg0: i32) -> (i32, i32, i32) {
    %c0_i32 = arith.constant 0 : i32
    %c0_i32_0 = arith.constant 0 : i32
    %c0_i32_1 = arith.constant 0 : i32
    %c0_i32_2 = arith.constant 0 : i32
    return %c0_i32, %c0_i32_0, %c0_i32_1 : i32, i32, i32
  }
  func.func @transform_4(%arg0: i32) -> i32 {
    %c0_i32 = arith.constant 0 : i32
    %c0_i32_0 = arith.constant 0 : i32
    return %c0_i32 : i32
  }
  func.func @transform_5(%arg0: i32) -> (i32, i32, i32, i32) {
    %c0_i32 = arith.constant 0 : i32
    %c0_i32_0 = arith.constant 0 : i32
    %c0_i32_1 = arith.constant 0 : i32
    %c0_i32_2 = arith.constant 0 : i32
    return %arg0, %c0_i32, %c0_i32_0, %c0_i32_1 : i32, i32, i32, i32
  }
}

</mosaic_0001>

<bundles_post_ra>
// kernel: tpu_custom_call.1
= control target key start
LH: loop header
LB: loop body
LE: loop exit
PB: predicated region body
PF: predicated region fallthrough
CT: control target
= control target key end

     0   :  { %10 = vsyncpa [#allocation3], 0  ;;  %s3601_s0 = inlined_call_operand.hbm [shape: f32[2,3,8,256], index: 0, kind: input, shape index: {}]   ;;  %s3602_s1 = inlined_call_operand.vmem [shape: f32[9,1,256], index: 1, kind: input, shape index: {}]   ;;  %s3603_s2 = inlined_call_operand.vmem [shape: f32[9,1,256], index: 2, kind: input, shape index: {}]   ;;  %s3604_s3 = inlined_call_operand.vmem [shape: f32[4,8,1], index: 3, kind: input, shape index: {}]   ;;  %s3605_s4 = inlined_call_operand.vmem [shape: f32[4], index: 4, kind: input, shape index: {}]   ;;  %s3606_s5 = inlined_call_operand.hbm [shape: f32[2,2,8,256], index: 5, kind: output, shape index: {}]  }
   0x1   :  { %12 = vsyncpa [#allocation3 + $0x1], 0 }
   0x2   :  { %13 = vsyncpa [#allocation5], 0 }
   0x3   :  { %14 = vsyncpa [#allocation4], 0 }
   0x4   :  { %16 = vsyncpa [#allocation4 + $0x1], 0  ;;  %s2164_s18 = smov 0   ;;  %s2166_s19 = smov 0  }
   0x5   :  { %s2168_s20 = smov 0   ;;  %s2170_s21 = smov 0  }
   0x6 LB: > { %s2185_s22 = sadd.s32 4294967295, %s2109_s21   ;;  %s1796_s23 = sadd.s32 4294967294, %s2109_s21   ;;  %s2109_s21 = sphi %s2170_s21, %s3679_s21   ;;  %s2105_s20 = sphi %s2168_s20, %s3678_s20   ;;  %s2101_s19 = sphi %s2166_s19, %s3677_s19   ;;  %s2097_s18 = sphi %s2164_s18, %s3676_s18  }
   0x7   : > { %s2189_s24 = sadd.s32 1, %s2109_s21   ;;  %s29_s25 = sadd.s32 1, %s2105_s20 }
   0x8   : > { %s26_s26 = ssub.s32 %s2109_s21, %s2189_s24  ;;  %p36_p0 = scmp.ne.s32.totalorder %s2105_s20, %s2101_s19 }
   0x9   : > { %p27_p1 = scmp.eq.s32.totalorder %s26_s26, 0  ;;  %p37_p2 = scmp.eq.s32.totalorder %s2109_s21, 0 }
   0xa   : > { %p42_p3 = scmp.ne.s32.totalorder %s2101_s19, %s2097_s18  ;;  %p3608_p4 = scmp.eq.s32.totalorder %s2185_s22, 0 }
   0xb   : > { %s2201_s27 = scalar_select %p27_p1, %s2105_s20, %s29_s25  }
   0xc   : > { %p2203_p5 = por %p37_p2, %p36_p0  ;;  %p2209_p6 = por %p3608_p4, %p42_p3 }
   0xd   : > { %p150_p7 = scmp.eq.s32.totalorder %s2185_s22, 1  ;;  %p156_p8 = scmp.eq.s32.totalorder %s1796_s23, 1 }
   0xe   : > { %s3628_s29 = scalar_select %p2209_p6, 1, 0 }
   0xf   : > { %p1797_p9 = scmp.ge.s32.totalorder %s2109_s21, 1  ;;  %p163_p10 = scmp.lt.s32.totalorder %s2109_s21, 3 }
  0x10   : > { %p2216_p11 = por %p150_p7, %p36_p0  ;;  %p2220_p12 = por %p156_p8, %p42_p3 }
  0x11   : > { %p2224_p13 = pnand %p1797_p9, %p163_p10  ;;  %s185_s10 = sshll.u32 %s3605_s4, 4  ;;  %s186_s10 = int_to_ptr.vmem [resolvable:$true] %s185_s10 }
  0x12   : > { %s3629_s30 = scalar_select %p2216_p11, 1, 0 }
  0x13   : > { %s3630_s6 = scalar_select %p2220_p12, 1, 0 }
  0x14   : > { %p1843_p1 = pneg %p2224_p13  ;;  %p1856_p2 = scmp.lt.s32.totalorder %s2109_s21, 2 }
  0x15   : > { %s196_s12 = sand.u32 1, %s2105_s20   ;;  %s1994_s15 = scalar_lea.vmem %s186_s10, 16 }
  0x16   : > { %p2237_p7 = pnand %p1843_p1, %p3608_p4  ;;  %p2244_p3 = pnand %p1856_p2, %p2203_p5 }
  0x17   : > { %s1832_s14 = smul.u32 48, %s196_s12  ;;  %p1995_p8 = scmp.ne.s32.totalorder %s186_s10, %s1994_s15 }
  0x18   : > { %p1996_p9 = pneg %p2237_p7  ;;  %p2002_p12 = scmp.lt.s32.totalorder %s186_s10, %s186_s10 }
  0x19   : > { %p2003_p11 = scmp.lt.s32.totalorder %s1994_s15, %s1994_s15 }
  0x1a   : > { %p1997_p10 = pnand %p1996_p9, %p1995_p8 }
  0x1b   : > { %p2004_p1 = por %p2003_p11, %p2002_p12 }
  0x1c   : > { %p1998_p0 = pneg %p1997_p10 }
  0x1e   : > { %p2005_p4 = pnand %p2004_p1, %p1998_p0 }
  0x20   : > { %2008 = shalt.err (!%p2005_p4)
}
  0x21   : > { %s2111_s16 = smov [#allocation6]   ;;  %s1833_s17 = smul.u32 768, %s2109_s21 }
  0x22   : > { %1846 = dma.vmem_to_smem (!%p2237_p7), %s186_s10, 16, %s2111_s16, [#allocation5]  }
  0x23   : > { %s200_s23 = scalar_lea.vmem [#allocation2], %s1832_s14  ;;  %s2258_s8 = scalar_lea.hbm %s3601_s0, %s1833_s17 }
  0x24   : > { %s207_s25 = sshll.u32 %s200_s23, 4  ;;  %s2260_s9 = scalar_lea.sflag [#allocation3], %s196_s12  ;;  %s2253_s25 = int_to_ptr.vmem [resolvable:$true] %s207_s25 }
  0x25   : > { %s2009_s11 = scalar_lea.hbm %s2258_s8, 768  ;;  %p2011_p5 = pneg %p2244_p3 }
  0x26   : > { %p2010_p4 = scmp.ne.s32.totalorder %s2258_s8, %s2009_s11  ;;  %s2014_s15 = scalar_lea.hbm %s3601_s0, 1536 }
  0x27   : > { %p2015_p0 = scmp.lt.u32.totalorder %s2258_s8, %s3601_s0  ;;  %p2016_p2 = scmp.lt.u32.totalorder %s2014_s15, %s2009_s11 }
  0x28   : > { %p2012_p11 = pnand %p2011_p5, %p2010_p4  ;;  %p2018_p8 = scmp.lt.u32.totalorder %s2009_s11, %s2258_s8 }
  0x29   : > { %p2017_p7 = por %p2016_p2, %p2015_p0 }
  0x2a   : > { %p2013_p12 = pneg %p2012_p11 }
  0x2b   : > { %p2019_p9 = por %p2018_p8, %p2017_p7 }
  0x2d   : > { %p2020_p10 = pnand %p2019_p9, %p2013_p12 }
  0x2f   : > { %2023 = shalt.err (!%p2020_p10)
}
  0x30   : > { %s2024_s12 = scalar_lea.vmem %s2253_s25, 768  ;;  %s2112_s23 = smov [#allocation2]  }
  0x31   : > { %p2025_p1 = scmp.ne.s32.totalorder %s2253_s25, %s2024_s12  ;;  %s2029_s26 = sshll.u32 %s2112_s23, 4  ;;  %s2030_s26 = int_to_ptr.vmem [resolvable:$false] %s2029_s26 }
  0x32   : > { %s2031_s28 = scalar_lea.vmem %s2030_s26, 1536  ;;  %p2032_p6 = scmp.lt.s32.totalorder %s2253_s25, %s2030_s26 }
  0x33   : > { %p2027_p4 = pnand %p2025_p1, %p2011_p5  ;;  %p2033_p0 = scmp.lt.s32.totalorder %s2031_s28, %s2024_s12 }
  0x35   : > { %p2028_p11 = pneg %p2027_p4  ;;  %p2034_p2 = por %p2033_p0, %p2032_p6 }
  0x37   : > { %p2035_p7 = pnand %p2034_p2, %p2028_p11 }
  0x39   : > { %2038 = shalt.err (!%p2035_p7)
}
  0x3a   : > { %s2113_s11 = smov 256   ;;  %s2114_s10 = smov 16  }
  0x3b   : > { %1850 = dma.hbm_to_vmem [thread:$0]  (!%p2244_p3), %s2258_s8, 768, %s2253_s25, %s2260_s9, %s2113_s11, %s2113_s11, %s2114_s10  }
  0x3c   : > { %219 = sbr.rel (%p2224_p13) target bundleno = 702 (0x2be), region = 40 }
  0x43   : > { %s2291_s14 = sand.u32 1, %s2101_s19   ;;  %p3634_p6 = scmp.ne.s32.totalorder %s3628_s29, 0 }
  0x44   : > { %s1834_s15 = smul.u32 48, %s2291_s14  ;;  %s222_s16 = scalar_lea.sflag [#allocation3], %s2291_s14 }
  0x46   : > { %s2295_s17 = scalar_lea.vmem [#allocation2], %s1834_s15 }
  0x47   : > { %2084 = dma.done.wait (%p3634_p6), %s222_s16, 768  }
  0x48   : > { %2086 = vsyncadd (%p3634_p6), %s222_s16, 4294966528  ;;  %p3635_p3 = scmp.eq.s32.totalorder %s2185_s22, 0 }
  0x4a   : > { %2088 = dma.done.wait (%p3635_p3), [#allocation5], 16   ;;  %p3636_p13 = pmov %p3635_p3 }
  0x4c   : > { %2090 = vsyncadd (%p3636_p13), [#allocation5], 4294967280 }
  0x4d   : > { %234 = sfence }
  0x4e   : > { %v1804_v0 = vld [vmem:[%s3604_s3 + $0x8] sm:$0xff]  ;;  %v2115_v1 = vmov 0   ;;  %v2309_v2 = vld [vmem:[%s2295_s17 + $0x20] sm:$0xff]  ;;  %s2116_s29 = smov 51   ;;  %s2117_s9 = smov 3   ;;  %v333_v17 = vlaneseq  ;;  %vm322_vm1 = vcmask 1040384  }
  0x4f   : > { %1912 = vset.pattern.permute.xlu0 %v2115_v1  ;;  %3637 = vst [vmem:[#allocation11_spill] sm:$0xff] %v2309_v2  ;;  %1913 = vset.pattern.permute.xlu1 %v2115_v1  ;;  %v263_v3 = vld [vmem:[%s3604_s3] sm:$0xff]  ;;  %v2317_v4 = vld [vmem:[%s2295_s17 + $0x28] sm:$0xff]  ;;  %s2118_s12 = smov 83   ;;  %s2345_s23 = sld [smem:[#allocation6 + $0x1]]  ;;  %v1814_v53 = vld [vmem:[%s3604_s3 + $0x10] sm:$0xff] }
  0x50   : > { %291 = vperm.xlu0 %1912, %v1804_v0   ;;  %567 = vrot.lane.b32.xlu1 %v2309_v2, %s2116_s29  ;;  %3638 = vst [vmem:[#allocation12_spill] sm:$0xff] %v2317_v4  ;;  %v2322_v5 = vld [vmem:[%s2295_s17] sm:$0xff]  ;;  %v2329_v6 = vld [vmem:[%s2295_s17 + $0x8] sm:$0xff]  ;;  %v2350_v22 = vand.u32 127, %v333_v17  ;;  %s2119_s26 = smov 48   ;;  %s2120_s28 = smov 80  }
  0x51   : > { %3639 = vst [vmem:[#allocation13_spill] sm:$0xff] %v2329_v6  ;;  %s2121_s11 = smov 45   ;;  %s2122_s10 = smov 125   ;;  %v1816_v52 = vld [vmem:[%s3604_s3 + $0x18] sm:$0xff]  ;;  %v2434_v55 = vld [vmem:[%s2295_s17 + $0x10] sm:$0xff] }
  0x52   : > { %vm335_vm0 = vcmp.lt.s32.totalorder %v2350_v22, 51  ;;  %vm358_vm2 = vcmp.lt.s32.totalorder %v2350_v22, 3  ;;  %s2123_s15 = smov 77   ;;  %3640 = vst [vmem:[#allocation14_spill] sm:$0xff] %v2434_v55  ;;  %v2437_v56 = vld [vmem:[%s2295_s17 + $0x18] sm:$0xff]  ;;  %s283_s17 = sld [smem:[#allocation6]] }
  0x53   : > { %3641 = vst [vmem:[#allocation15_spill] sm:$0xff] %v2437_v56  ;;  %vm382_vm3 = vcmp.lt.s32.totalorder %v2350_v22, 83  ;;  %vm406_vm4 = vcmp.lt.s32.totalorder %v2350_v22, 48  ;;  %vm447_vm5 = vcmp.lt.s32.totalorder %v2350_v22, 80  ;;  %vm471_vm6 = vcmp.lt.s32.totalorder %v2350_v22, 45  ;;  %s2130_s16 = smov 127  }
  0x54   : > { %266 = vperm.xlu0 %1912, %v263_v3   ;;  %571 = vrot.lane.b32.xlu1 %v2317_v4, %s2116_s29  ;;  %vm495_vm7 = vcmp.lt.s32.totalorder %v2350_v22, 125  ;;  %vm519_vm8 = vcmp.lt.s32.totalorder %v2350_v22, 77  ;;  %s2131_s7 = smov 111   ;;  %vm1049_vm9 = vcmp.lt.s32.totalorder %v2350_v22, 17  ;;  %vm1072_vm10 = vcmp.lt.s32.totalorder %v2350_v22, 1  ;;  %s1815_s13 = sld [smem:[#allocation6 + $0x2]] }
  0x55   : > { %v326_v36 = vstv %s2345_s23  ;;  %s2978_s23 = sld [smem:[#allocation6 + $0x3]]  ;;  %vm1096_vm11 = vcmp.lt.s32.totalorder %v2350_v22, 113  ;;  %vm1120_vm12 = vcmp.lt.s32.totalorder %v2350_v22, 16  ;;  %vm1161_vm13 = vcmp.lt.s32.totalorder %v2350_v22, 112  ;;  %p3673_p12 = scmp.ne.s32.totalorder %s3629_s30, 0 }
  0x56   : > { %vm1185_vm14 = vcmp.lt.s32.totalorder %v2350_v22, 15  ;;  %vm1209_vm15 = vcmp.lt.s32.totalorder %v2350_v22, 127 }
  0x58   : > { %565 = vrot.lane.b32.xlu0 %v2322_v5, %s2116_s29  ;;  %613 = vrot.lane.b32.xlu1 %v2309_v2, %s2117_s9 }
  0x5c   : > { %569 = vrot.lane.b32.xlu0 %v2329_v6, %s2116_s29  ;;  %617 = vrot.lane.b32.xlu1 %v2317_v4, %s2117_s9 }
  0x60   : > { %611 = vrot.lane.b32.xlu0 %v2322_v5, %s2117_s9 }
  0x64   : > { %615 = vrot.lane.b32.xlu0 %v2329_v6, %s2117_s9 }
  0x68   : > { %657 = vrot.lane.b32.xlu0 %v2322_v5, %s2118_s12 }
  0xc2   : > { %v2431_v54 = vpop.permute.xlu1 %567 }
  0xc6   : > { %v2443_v59 = vpop.permute.xlu1 %571 }
  0xca   : > { %v2445_v0 = vpop.permute.xlu1 %613 }
  0xcf   : > { %v292_v7 = vpop.permute.xlu0 %291 }
  0xd0   : > { %v294_v8 = vmul.f32 %v292_v7, %v2322_v5  ;;  %v295_v9 = vmul.f32 %v292_v7, %v2329_v6  ;;  %v308_v10 = vmul.f32 %v292_v7, %v2309_v2  ;;  %v309_v11 = vmul.f32 %v292_v7, %v2317_v4 }
  0xd2   : > { %v296_v12 = vrot.slane %v294_v8, 4  ;;  %v302_v13 = vrot.slane %v295_v9, 4  ;;  %v310_v14 = vrot.slane %v308_v10, 4  ;;  %v316_v15 = vrot.slane %v309_v11, 4 }
  0xd3   : > { %v2347_v16 = vpop.permute.xlu0 %266 }
  0xd4   : > { %v297_v18 = vadd.f32 %v296_v12, %v294_v8  ;;  %v303_v19 = vadd.f32 %v302_v13, %v295_v9  ;;  %v311_v20 = vadd.f32 %v310_v14, %v308_v10  ;;  %v317_v21 = vadd.f32 %v316_v15, %v309_v11  ;;  %v2449_v8 = vpop.permute.xlu1 %617 }
  0xd5   : > { %v269_v57 = vmul.f32 %v2347_v16, %v2434_v55  ;;  %v270_v58 = vmul.f32 %v2347_v16, %v2437_v56  ;;  %v343_v16 = vshrl.u32 %v333_v17, 7 }
  0xd6   : > { %v298_v23 = vrot.slane %v297_v18, 2  ;;  %v304_v24 = vrot.slane %v303_v19, 2  ;;  %v312_v25 = vrot.slane %v311_v20, 2  ;;  %v318_v26 = vrot.slane %v317_v21, 2 }
  0xd7   : > { %v566_v27 = vpop.permute.xlu0 %565  ;;  %v271_v60 = vrot.slane %v269_v57, 4  ;;  %v277_v61 = vrot.slane %v270_v58, 4 }
  0xd8   : > { %v299_v28 = vadd.f32 %v298_v23, %v297_v18  ;;  %v305_v29 = vadd.f32 %v304_v24, %v303_v19  ;;  %v313_v30 = vadd.f32 %v312_v25, %v311_v20  ;;  %v319_v31 = vadd.f32 %v318_v26, %v317_v21  ;;  %v340_v23 = vld [vmem:[%s3602_s1] sm:$0x3]  ;;  %v1806_v26 = vld [vmem:[%s3602_s1 + $0x2] sm:$0x3] }
  0xd9   : > { %v272_v62 = vadd.f32 %v271_v60, %v269_v57  ;;  %v278_v63 = vadd.f32 %v277_v61, %v270_v58  ;;  %v284_v21 = vstv %s283_s17  ;;  %v2455_v24 = vsub.s32 0, %v343_v16 }
  0xda   : > { %v300_v32 = vrot.slane %v299_v28, 1  ;;  %v306_v33 = vrot.slane %v305_v29, 1  ;;  %v314_v34 = vrot.slane %v313_v30, 1  ;;  %v320_v35 = vrot.slane %v319_v31, 1 }
  0xdb   : > { %v570_v37 = vpop.permute.xlu0 %569  ;;  %v273_v1 = vrot.slane %v272_v62, 2  ;;  %v279_v3 = vrot.slane %v278_v63, 2 }
  0xdc   : > { %v301_v38 = vadd.f32 %v300_v32, %v299_v28  ;;  %v307_v39 = vadd.f32 %v306_v33, %v305_v29  ;;  %v315_v40 = vadd.f32 %v314_v34, %v313_v30  ;;  %v321_v41 = vadd.f32 %v320_v35, %v319_v31  ;;  %v1807_v30 = vld [vmem:[%s3602_s1 + $0x4] sm:$0x3] }
  0xdd   : > { %v2356_v42 = vsel %vm335_vm0, %v566_v27, %v570_v37  ;;  %v2360_v43 = vsel %vm335_vm0, %v570_v37, %v566_v27  ;;  %v274_v9 = vadd.f32 %v273_v1, %v272_v62  ;;  %v280_v10 = vadd.f32 %v279_v3, %v278_v63 }
  0xde   : > { %v323_v44 = vsel %vm322_vm1, %v301_v38, %v315_v40  ;;  %v324_v47 = vsel %vm322_vm1, %v307_v39, %v321_v41  ;;  %v2460_v28 = vsub.s32 1, %v343_v16  ;;  %v2479_v35 = vrot.slane %v340_v23, %v2455_v24 }
  0xdf   : > { %v2363_v45 = vadd.f32 %v326_v36, %v323_v44  ;;  %v612_v46 = vpop.permute.xlu0 %611  ;;  %v2371_v48 = vadd.f32 %v326_v36, %v324_v47  ;;  %v275_v13 = vrot.slane %v274_v9, 1  ;;  %v281_v14 = vrot.slane %v280_v10, 1  ;;  %v1808_v47 = vld [vmem:[%s3602_s1 + $0x6] sm:$0x3] }
  0xe0   : > { %v2482_v36 = vrot.slane %v340_v23, %v2460_v28  ;;  %v2485_v37 = vrot.slane %v1806_v26, %v2455_v24  ;;  %v2488_v38 = vrot.slane %v1806_v26, %v2460_v28  ;;  %v2493_v44 = vrot.slane %v1807_v30, %v2455_v24 }
  0xe1   : > { %354 = vrot.lane.b32.xlu0 %v2363_v45, %s2117_s9  ;;  %329 = vrot.lane.b32.xlu1 %v2363_v45, %s2116_s29  ;;  %v276_v19 = vadd.f32 %v275_v13, %v274_v9  ;;  %v282_v20 = vadd.f32 %v281_v14, %v280_v10  ;;  %v2505_v58 = vrot.slane %v1807_v30, %v2460_v28 }
  0xe2   : > { %v2511_v62 = vrot.slane %v1808_v47, %v2455_v24  ;;  %v2520_v9 = vrot.slane %v1808_v47, %v2460_v28 }
  0xe3   : > { %v616_v49 = vpop.permute.xlu0 %615  ;;  %v2470_v31 = vadd.f32 %v284_v21, %v276_v19  ;;  %v2472_v32 = vadd.f32 %v284_v21, %v282_v20 }
  0xe4   : > { %v2375_v50 = vsel %vm358_vm2, %v612_v46, %v616_v49  ;;  %v2379_v51 = vsel %vm358_vm2, %v616_v49, %v612_v46 }
  0xe5   : > { %378 = vrot.lane.b32.xlu0 %v2363_v45, %s2118_s12  ;;  %331 = vrot.lane.b32.xlu1 %v2371_v48, %s2116_s29  ;;  %v427_v21 = vmul.f32 %v2371_v48, %v2472_v32 }
  0xe7   : > { %v2447_v7 = vpop.permute.xlu0 %657 }
  0xe9   : > { %402 = vrot.lane.b32.xlu0 %v2363_v45, %s2119_s26  ;;  %356 = vrot.lane.b32.xlu1 %v2371_v48, %s2117_s9  ;;  %s1803_s9 = sshll.u32 %s2291_s14, 5 }
  0xed   : > { %443 = vrot.lane.b32.xlu0 %v2363_v45, %s2120_s28  ;;  %380 = vrot.lane.b32.xlu1 %v2371_v48, %s2118_s12 }
  0xf1   : > { %467 = vrot.lane.b32.xlu0 %v2363_v45, %s2121_s11  ;;  %404 = vrot.lane.b32.xlu1 %v2371_v48, %s2119_s26 }
  0xf5   : > { %491 = vrot.lane.b32.xlu0 %v2363_v45, %s2122_s10  ;;  %445 = vrot.lane.b32.xlu1 %v2371_v48, %s2120_s28 }
  0xf9   : > { %515 = vrot.lane.b32.xlu0 %v2363_v45, %s2123_s15  ;;  %469 = vrot.lane.b32.xlu1 %v2371_v48, %s2121_s11 }
  0xfd   : > { %661 = vrot.lane.b32.xlu0 %v2329_v6, %s2118_s12  ;;  %493 = vrot.lane.b32.xlu1 %v2371_v48, %s2122_s10 }
 0x101   : > { %703 = vrot.lane.b32.xlu0 %v2322_v5, %s2119_s26  ;;  %517 = vrot.lane.b32.xlu1 %v2371_v48, %s2123_s15  ;;  %v1810_v48 = vld [vmem:[%s3602_s1 + $0xa] sm:$0x3] }
 0x105   : > { %707 = vrot.lane.b32.xlu0 %v2329_v6, %s2119_s26  ;;  %659 = vrot.lane.b32.xlu1 %v2309_v2, %s2118_s12 }
 0x109   : > { %783 = vrot.lane.b32.xlu0 %v2322_v5, %s2120_s28  ;;  %663 = vrot.lane.b32.xlu1 %v2317_v4, %s2118_s12  ;;  %s2124_s12 = smov 17  }
 0x10d   : > { %787 = vrot.lane.b32.xlu0 %v2329_v6, %s2120_s28  ;;  %705 = vrot.lane.b32.xlu1 %v2309_v2, %s2119_s26 }
 0x111   : > { %829 = vrot.lane.b32.xlu0 %v2322_v5, %s2121_s11  ;;  %709 = vrot.lane.b32.xlu1 %v2317_v4, %s2119_s26  ;;  %s2125_s26 = smov 1  }
 0x115   : > { %833 = vrot.lane.b32.xlu0 %v2329_v6, %s2121_s11  ;;  %785 = vrot.lane.b32.xlu1 %v2309_v2, %s2120_s28 }
 0x119   : > { %875 = vrot.lane.b32.xlu0 %v2322_v5, %s2122_s10  ;;  %789 = vrot.lane.b32.xlu1 %v2317_v4, %s2120_s28  ;;  %s2126_s28 = smov 113  }
 0x11d   : > { %879 = vrot.lane.b32.xlu0 %v2329_v6, %s2122_s10  ;;  %831 = vrot.lane.b32.xlu1 %v2309_v2, %s2121_s11 }
 0x121   : > { %921 = vrot.lane.b32.xlu0 %v2322_v5, %s2123_s15  ;;  %835 = vrot.lane.b32.xlu1 %v2317_v4, %s2121_s11  ;;  %s2127_s11 = smov 16  }
 0x125   : > { %925 = vrot.lane.b32.xlu0 %v2329_v6, %s2123_s15  ;;  %877 = vrot.lane.b32.xlu1 %v2309_v2, %s2122_s10 }
 0x129   : > { %1008 = vperm.xlu0 %1912, %v1816_v52   ;;  %881 = vrot.lane.b32.xlu1 %v2317_v4, %s2122_s10  ;;  %s2128_s10 = smov 112  }
 0x12d   : > { %923 = vrot.lane.b32.xlu1 %v2309_v2, %s2123_s15 }
 0x131   : > { %927 = vrot.lane.b32.xlu1 %v2317_v4, %s2123_s15  ;;  %s2129_s15 = smov 15  }
 0x135   : > { %983 = vperm.xlu1 %1913, %v1814_v53  }
 0x153   : > { %v355_v11 = vpop.permute.xlu0 %354  ;;  %v330_v12 = vpop.permute.xlu1 %329 }
 0x157   : > { %v379_v15 = vpop.permute.xlu0 %378  ;;  %v332_v18 = vpop.permute.xlu1 %331 }
 0x158   : > { %v336_v33 = vsel %vm335_vm0, %v330_v12, %v332_v18  ;;  %v337_v34 = vsel %vm335_vm0, %v332_v18, %v330_v12 }
 0x159   : > { %v338_v49 = vmul.f32 %v337_v34, %v2470_v31  ;;  %v339_v52 = vmul.f32 %v336_v33, %v2472_v32  ;;  %v426_v34 = vmul.f32 %v2363_v45, %v2470_v31  ;;  %v2581_v45 = vrot.slane %v1810_v48, %v2455_v24 }
 0x15b   : > { %v403_v25 = vpop.permute.xlu0 %402  ;;  %v357_v27 = vpop.permute.xlu1 %356  ;;  %v2527_v12 = vmul.f32 %v2479_v35, %v338_v49  ;;  %v2530_v13 = vmul.f32 %v2482_v36, %v339_v52  ;;  %v1811_v49 = vld [vmem:[%s3602_s1 + $0xc] sm:$0x3] }
 0x15c   : > { %v359_v17 = vsel %vm358_vm2, %v355_v11, %v357_v27  ;;  %v360_v29 = vsel %vm358_vm2, %v357_v27, %v355_v11  ;;  %v1809_v11 = vld [vmem:[%s3602_s1 + $0x8] sm:$0x3] }
 0x15d   : > { %v361_v39 = vmul.f32 %v360_v29, %v2470_v31  ;;  %v362_v40 = vmul.f32 %v359_v17, %v2472_v32  ;;  %v2547_v23 = vrot.slane %v1809_v11, %v2460_v28  ;;  %v2563_v33 = vrot.slane %v1809_v11, %v2455_v24 }
 0x15f   : > { %v444_v41 = vpop.permute.xlu0 %443  ;;  %v381_v46 = vpop.permute.xlu1 %380  ;;  %v2514_v63 = vmul.f32 %v2485_v37, %v361_v39  ;;  %v2517_v1 = vmul.f32 %v2488_v38, %v362_v40  ;;  %v2578_v52 = vmul.f32 %v2547_v23, %v427_v21 }
 0x160   : > { %v383_v53 = vsel %vm382_vm3, %v379_v15, %v381_v46  ;;  %v384_v57 = vsel %vm382_vm3, %v381_v46, %v379_v15 }
 0x161   : > { %v385_v60 = vmul.f32 %v383_v53, %v2470_v31  ;;  %v386_v61 = vmul.f32 %v384_v57, %v2472_v32  ;;  %v539_v26 = vmax.f32 %v2527_v12, %v2514_v63  ;;  %v2584_v53 = vrot.slane %v1810_v48, %v2460_v28 }
 0x163   : > { %v468_v3 = vpop.permute.xlu0 %467  ;;  %v405_v10 = vpop.permute.xlu1 %404  ;;  %v2537_v16 = vmul.f32 %v2493_v44, %v385_v60  ;;  %v2540_v18 = vmul.f32 %v2505_v58, %v386_v61 }
 0x164   : > { %v407_v14 = vsel %vm406_vm4, %v403_v25, %v405_v10  ;;  %v408_v15 = vsel %vm406_vm4, %v405_v10, %v403_v25  ;;  %v540_v25 = vmax.f32 %v2530_v13, %v2517_v1 }
 0x165   : > { %v409_v19 = vmul.f32 %v408_v15, %v2470_v31  ;;  %v410_v20 = vmul.f32 %v407_v14, %v2472_v32  ;;  %v541_v46 = vmax.f32 %v539_v26, %v2537_v16  ;;  %v1812_v14 = vld [vmem:[%s3602_s1 + $0xe] sm:$0x3]  ;;  %v2594_v15 = vmul.f32 %v2563_v33, %v426_v34 }
 0x166   : > { %v542_v47 = vmax.f32 %v540_v25, %v2540_v18  ;;  %v2604_v26 = vrot.slane %v1811_v49, %v2460_v28  ;;  %v2613_v34 = vrot.slane %v1812_v14, %v2460_v28 }
 0x167   : > { %v2554_v27 = vmul.f32 %v2511_v62, %v409_v19  ;;  %v2557_v17 = vmul.f32 %v2520_v9, %v410_v20  ;;  %v492_v29 = vpop.permute.xlu0 %491  ;;  %v446_v30 = vpop.permute.xlu1 %445  ;;  %v2597_v19 = vrot.slane %v1811_v49, %v2455_v24 }
 0x168   : > { %v448_v39 = vsel %vm447_vm5, %v444_v41, %v446_v30  ;;  %v449_v40 = vsel %vm447_vm5, %v446_v30, %v444_v41  ;;  %3643 = vst [vmem:[#allocation17_spill] sm:$0xff] %v2604_v26  ;;  %v2610_v30 = vrot.slane %v1812_v14, %v2455_v24  ;;  %3645 = vst [vmem:[#allocation19_spill] sm:$0xff] %v2613_v34 }
 0x169   : > { %v543_v41 = vmax.f32 %v541_v46, %v2554_v27  ;;  %v544_v57 = vmax.f32 %v542_v47, %v2557_v17  ;;  %v450_v60 = vmul.f32 %v448_v39, %v2470_v31  ;;  %v451_v61 = vmul.f32 %v449_v40, %v2472_v32  ;;  %3642 = vst [vmem:[#allocation16_spill] sm:$0xff] %v2597_v19 }
 0x16a   : > { %3644 = vst [vmem:[#allocation18_spill] sm:$0xff] %v2610_v30 }
 0x16b   : > { %v516_v10 = vpop.permute.xlu0 %515  ;;  %v470_v11 = vpop.permute.xlu1 %469  ;;  %v546_v39 = vmax.f32 %v544_v57, %v2578_v52  ;;  %v2617_v40 = vmul.f32 %v2581_v45, %v450_v60  ;;  %v545_v46 = vmax.f32 %v543_v41, %v2594_v15 }
 0x16c   : > { %v472_v20 = vsel %vm471_vm6, %v468_v3, %v470_v11  ;;  %v473_v21 = vsel %vm471_vm6, %v470_v11, %v468_v3  ;;  %v2620_v3 = vmul.f32 %v2584_v53, %v451_v61  ;;  %v1813_v11 = vld [vmem:[%s3602_s1 + $0x10] sm:$0x3] }
 0x16d   : > { %v474_v25 = vmul.f32 %v473_v21, %v2470_v31  ;;  %v475_v48 = vmul.f32 %v472_v20, %v2472_v32  ;;  %v2642_v21 = vrot.slane %v1813_v11, %v2455_v24  ;;  %v2645_v56 = vrot.slane %v1813_v11, %v2460_v28 }
 0x16f   : > { %v2623_v47 = vpop.permute.xlu0 %661  ;;  %v494_v49 = vpop.permute.xlu1 %493  ;;  %v2634_v60 = vmul.f32 %v2597_v19, %v474_v25  ;;  %v2637_v41 = vmul.f32 %v2604_v26, %v475_v48 }
 0x170   : > { %v496_v14 = vsel %vm495_vm7, %v492_v29, %v494_v49  ;;  %v497_v57 = vsel %vm495_vm7, %v494_v49, %v492_v29  ;;  %v547_v29 = vmax.f32 %v545_v46, %v2617_v40  ;;  %v548_v49 = vmax.f32 %v546_v39, %v2620_v3 }
 0x171   : > { %v498_v61 = vmul.f32 %v496_v14, %v2470_v31  ;;  %v499_v20 = vmul.f32 %v497_v57, %v2472_v32 }
 0x172   : > { %v549_v26 = vmax.f32 %v547_v29, %v2634_v60  ;;  %v550_v46 = vmax.f32 %v548_v49, %v2637_v41 }
 0x173   : > { %v2650_v25 = vmul.f32 %v2610_v30, %v498_v61  ;;  %v2653_v48 = vmul.f32 %v2613_v34, %v499_v20  ;;  %v2655_v55 = vpop.permute.xlu0 %703  ;;  %v518_v14 = vpop.permute.xlu1 %517 }
 0x174   : > { %v520_v57 = vsel %vm519_vm8, %v516_v10, %v518_v14  ;;  %v521_v11 = vsel %vm519_vm8, %v518_v14, %v516_v10 }
 0x175   : > { %v522_v39 = vmul.f32 %v520_v57, %v2470_v31  ;;  %v523_v61 = vmul.f32 %v521_v11, %v2472_v32  ;;  %v551_v20 = vmax.f32 %v549_v26, %v2650_v25  ;;  %v552_v34 = vmax.f32 %v550_v46, %v2653_v48 }
 0x177   : > { %v537_v30 = vmul.f32 %v2642_v21, %v522_v39  ;;  %v538_v2 = vmul.f32 %v2645_v56, %v523_v61  ;;  %v660_v4 = vpop.permute.xlu1 %659  ;;  %v708_v19 = vpop.permute.xlu0 %707 }
 0x179   : > { %v2669_v6 = vmax.f32 %v551_v20, %v537_v30  ;;  %v2671_v10 = vmax.f32 %v552_v34, %v538_v2 }
 0x17b   : > { %v911_v29 = vsub.f32 %v537_v30, %v2669_v6  ;;  %v555_v31 = vsub.f32 %v2527_v12, %v2669_v6  ;;  %v556_v32 = vsub.f32 %v2530_v13, %v2671_v10  ;;  %v664_v26 = vpop.permute.xlu1 %663  ;;  %v601_v49 = vsub.f32 %v2514_v63, %v2669_v6  ;;  %v784_v12 = vpop.permute.xlu0 %783 }
 0x17c   : > { %v602_v14 = vsub.f32 %v2517_v1, %v2671_v10  ;;  %v647_v34 = vsub.f32 %v2537_v16, %v2669_v6  ;;  %v648_v30 = vsub.f32 %v2540_v18, %v2671_v10  ;;  %v693_v13 = vsub.f32 %v2554_v27, %v2669_v6 }
 0x17d   : > { %v913_v57 = vmul.f32 1.442695, %v911_v29  ;;  %v557_v11 = vmul.f32 1.442695, %v555_v31  ;;  %v559_v46 = vmul.f32 1.442695, %v556_v32  ;;  %v2692_v63 = vsel %vm335_vm0, %v2431_v54, %v2443_v59 }
 0x17e   : > { %v603_v39 = vmul.f32 1.442695, %v601_v49  ;;  %v605_v1 = vmul.f32 1.442695, %v602_v14  ;;  %v694_v16 = vsub.f32 %v2557_v17, %v2671_v10  ;;  %v2700_v18 = vsel %vm335_vm0, %v2443_v59, %v2431_v54 }
 0x17f   : > { %v706_v61 = vpop.permute.xlu1 %705  ;;  %1914 = vpow2.f32 %v913_v57  ;;  %v912_v27 = vsub.f32 %v538_v2, %v2671_v10  ;;  %v649_v20 = vmul.f32 1.442695, %v647_v34  ;;  %v2707_v29 = vsel %vm358_vm2, %v2445_v0, %v2449_v8  ;;  %v788_v14 = vpop.permute.xlu0 %787 }
 0x180   : > { %1916 = vpow2.f32 %v557_v11  ;;  %v651_v31 = vmul.f32 1.442695, %v648_v30  ;;  %v739_v17 = vsub.f32 %v2594_v15, %v2669_v6  ;;  %v2715_v54 = vsel %vm358_vm2, %v2449_v8, %v2445_v0 }
 0x181   : > { %1918 = vpow2.f32 %v559_v46  ;;  %v695_v2 = vmul.f32 1.442695, %v693_v13  ;;  %v740_v59 = vsub.f32 %v2578_v52, %v2671_v10  ;;  %v2723_v49 = vsel %vm382_vm3, %v2447_v7, %v2623_v47 }
 0x182   : > { %1920 = vpow2.f32 %v603_v39  ;;  %v697_v15 = vmul.f32 1.442695, %v694_v16  ;;  %v773_v57 = vsub.f32 %v2617_v40, %v2669_v6  ;;  %v2731_v0 = vsel %vm382_vm3, %v2623_v47, %v2447_v7 }
 0x183   : > { %v710_v32 = vpop.permute.xlu1 %709  ;;  %1922 = vpow2.f32 %v605_v1  ;;  %v915_v8 = vmul.f32 1.442695, %v912_v27  ;;  %v774_v52 = vsub.f32 %v2620_v3, %v2671_v10  ;;  %v2738_v11 = vsel %vm406_vm4, %v2655_v55, %v708_v19 }
 0x184   : > { %1924 = vpow2.f32 %v649_v20  ;;  %v741_v34 = vmul.f32 1.442695, %v739_v17  ;;  %v819_v40 = vsub.f32 %v2634_v60, %v2669_v6  ;;  %v2745_v7 = vsel %vm406_vm4, %v708_v19, %v2655_v55 }
 0x185   : > { %1926 = vpow2.f32 %v651_v31  ;;  %v743_v47 = vmul.f32 1.442695, %v740_v59  ;;  %v820_v3 = vsub.f32 %v2637_v41, %v2671_v10  ;;  %v775_v30 = vmul.f32 1.442695, %v773_v57 }
 0x186   : > { %1928 = vpow2.f32 %v695_v2  ;;  %v865_v39 = vsub.f32 %v2650_v25, %v2669_v6  ;;  %v866_v13 = vsub.f32 %v2653_v48, %v2671_v10  ;;  %v2755_v60 = vsel %vm382_vm3, %v660_v4, %v664_v26  ;;  %v2771_v25 = vpop.permute.xlu0 %829 }
 0x187   : > { %v786_v46 = vpop.permute.xlu1 %785  ;;  %1930 = vpow2.f32 %v697_v15  ;;  %v2759_v55 = vsel %vm382_vm3, %v664_v26, %v660_v4  ;;  %v777_v19 = vmul.f32 1.442695, %v774_v52  ;;  %v2765_v1 = vsel %vm447_vm5, %v784_v12, %v788_v14 }
 0x188   : > { %1932 = vpow2.f32 %v915_v8  ;;  %v2769_v6 = vsel %vm447_vm5, %v788_v14, %v784_v12  ;;  %v821_v48 = vmul.f32 1.442695, %v819_v40  ;;  %v2775_v4 = vsel %vm406_vm4, %v706_v61, %v710_v32 }
 0x189   : > { %v2761_v41 = vpop.eup %1914  ;;  %1934 = vpow2.f32 %v741_v34  ;;  %v2779_v26 = vsel %vm406_vm4, %v710_v32, %v706_v61  ;;  %v2781_v16 = vmul.f32 1.442695, %v820_v3  ;;  %v2784_v31 = vmul.f32 1.442695, %v865_v39 }
 0x18a   : > { %v1917_v10 = vpop.eup %1916  ;;  %1936 = vpow2.f32 %v743_v47  ;;  %v2786_v17 = vmul.f32 1.442695, %v866_v13  ;;  %vm1233_vm0 = vcmp.lt.s32.totalorder %v2350_v22, 111 }
 0x18b   : > { %v790_v27 = vpop.permute.xlu1 %789  ;;  %v1919_v20 = vpop.eup %1918  ;;  %v563_v12 = vmul.f32 %v1917_v10, %v2479_v35  ;;  %1938 = vpow2.f32 %v775_v30 }
 0x18c   : > { %v1921_v2 = vpop.eup %1920  ;;  %v564_v59 = vmul.f32 %v1919_v20, %v2482_v36  ;;  %1940 = vpow2.f32 %v777_v19  ;;  %v2791_v15 = vsel %vm447_vm5, %v786_v46, %v790_v27  ;;  %v2795_v61 = vsel %vm447_vm5, %v790_v27, %v786_v46 }
 0x18d   : > { %v1923_v32 = vpop.eup %1922  ;;  %v580_v35 = vrot.slane %v563_v12, %v2455_v24  ;;  %v607_v14 = vadd.f32 %v1921_v2, %v1917_v10  ;;  %v609_v57 = vmul.f32 %v1921_v2, %v2485_v37  ;;  %1942 = vpow2.f32 %v821_v48  ;;  %v2807_v37 = vpop.permute.xlu0 %833 }
 0x18e   : > { %v1925_v8 = vpop.eup %1924  ;;  %v584_v52 = vrot.slane %v564_v59, %v2455_v24  ;;  %v608_v36 = vadd.f32 %v1923_v32, %v1919_v20  ;;  %v610_v34 = vmul.f32 %v1923_v32, %v2488_v38  ;;  %v596_v40 = vrot.slane %v564_v59, %v2460_v28 }
 0x18f   : > { %v2802_v47 = vpop.permute.xlu1 %831  ;;  %v1927_v3 = vpop.eup %1926  ;;  %v585_v46 = vmul.f32 %v580_v35, %v2360_v43  ;;  %v626_v30 = vrot.slane %v609_v57, %v2455_v24  ;;  %v653_v39 = vadd.f32 %v1925_v8, %v607_v14  ;;  %v655_v13 = vmul.f32 %v1925_v8, %v2493_v44 }
 0x190   : > { %v1929_v19 = vpop.eup %1928  ;;  %v586_v48 = vmul.f32 %v584_v52, %v2356_v42  ;;  %v630_v10 = vrot.slane %v610_v34, %v2455_v24  ;;  %v656_v38 = vmul.f32 %v1927_v3, %v2505_v58  ;;  %v592_v27 = vrot.slane %v563_v12, %v2460_v28 }
 0x191   : > { %v2813_v20 = vpop.eup %1930  ;;  %v631_v43 = vmul.f32 %v626_v30, %v2379_v51  ;;  %v2816_v2 = vadd.f32 %v1927_v3, %v608_v36  ;;  %v672_v59 = vrot.slane %v655_v13, %v2455_v24  ;;  %v701_v44 = vmul.f32 %v1929_v19, %v2511_v62 }
 0x192   : > { %v2820_v32 = vpop.eup %1932  ;;  %v632_v42 = vmul.f32 %v630_v10, %v2375_v50  ;;  %v676_v35 = vrot.slane %v656_v38, %v2455_v24  ;;  %v2824_v14 = vadd.f32 %v1929_v19, %v653_v39  ;;  %v702_v58 = vmul.f32 %v2813_v20, %v2520_v9 }
 0x193   : > { %v2828_v12 = vpop.permute.xlu1 %835  ;;  %v2830_v51 = vpop.eup %1934  ;;  %v633_v8 = vadd.f32 %v631_v43, %v585_v46  ;;  %v677_v52 = vmul.f32 %v672_v59, %v2723_v49  ;;  %v718_v62 = vrot.slane %v701_v44, %v2455_v24  ;;  %v598_v36 = vmul.f32 %v596_v40, %v2692_v63 }
 0x194   : > { %v2835_v3 = vpop.eup %1936  ;;  %v634_v50 = vadd.f32 %v632_v42, %v586_v48  ;;  %v678_v30 = vmul.f32 %v676_v35, %v2731_v0  ;;  %v722_v39 = vrot.slane %v702_v58, %v2455_v24  ;;  %v642_v9 = vrot.slane %v610_v34, %v2460_v28  ;;  %v2845_v59 = vpop.permute.xlu0 %875 }
 0x195   : > { %v2840_v19 = vpop.eup %1938  ;;  %v679_v10 = vadd.f32 %v677_v52, %v633_v8  ;;  %v723_v46 = vmul.f32 %v718_v62, %v2745_v7  ;;  %v688_v49 = vrot.slane %v656_v38, %v2460_v28  ;;  %v597_v43 = vmul.f32 %v592_v27, %v2700_v18 }
 0x196   : > { %v2847_v63 = vpop.eup %1940  ;;  %v680_v40 = vadd.f32 %v678_v30, %v634_v50  ;;  %v724_v0 = vmul.f32 %v722_v39, %v2738_v11  ;;  %v644_v48 = vmul.f32 %v642_v9, %v2707_v29  ;;  %v638_v34 = vrot.slane %v609_v57, %v2460_v28 }
 0x197   : > { %v2852_v42 = vpop.eup %1942  ;;  %v725_v35 = vadd.f32 %v723_v46, %v679_v10  ;;  %v684_v7 = vrot.slane %v655_v13, %v2460_v28  ;;  %v690_v38 = vmul.f32 %v688_v49, %v2759_v55  ;;  %v747_v18 = vmul.f32 %v2830_v51, %v2563_v33  ;;  %v2858_v27 = vpop.permute.xlu1 %877 }
 0x198   : > { %v726_v8 = vadd.f32 %v724_v0, %v680_v40  ;;  %v646_v52 = vadd.f32 %v644_v48, %v598_v36  ;;  %v643_v11 = vmul.f32 %v638_v34, %v2715_v54  ;;  %v748_v29 = vmul.f32 %v2835_v3, %v2547_v23  ;;  %v880_v9 = vpop.permute.xlu0 %879  ;;  %v3647_v34 = vld [vmem:[#allocation16_spill] sm:$0xff] }
 0x199   : > { %v689_v57 = vmul.f32 %v684_v7, %v2755_v60  ;;  %v752_v62 = vrot.slane %v747_v18, %v2455_v24  ;;  %v781_v13 = vmul.f32 %v2840_v19, %v2581_v45  ;;  %v782_v55 = vmul.f32 %v2847_v63, %v2584_v53  ;;  %v3646_v45 = vld [vmem:[#allocation13_spill] sm:$0xff] }
 0x19a   : > { %v645_v33 = vadd.f32 %v643_v11, %v597_v43  ;;  %v692_v50 = vadd.f32 %v690_v38, %v646_v52  ;;  %v756_v30 = vrot.slane %v748_v29, %v2455_v24  ;;  %v734_v36 = vrot.slane %v702_v58, %v2460_v28 }
 0x19b   : > { %v757_v54 = vmul.f32 %v752_v62, %v2322_v5  ;;  %v798_v23 = vrot.slane %v781_v13, %v2455_v24  ;;  %v802_v60 = vrot.slane %v782_v55, %v2455_v24  ;;  %v730_v39 = vrot.slane %v701_v44, %v2460_v28  ;;  %v882_v40 = vpop.permute.xlu1 %881 }
 0x19c   : > { %v691_v10 = vadd.f32 %v689_v57, %v645_v33  ;;  %v758_v46 = vmul.f32 %v756_v30, %v3646_v45  ;;  %v736_v53 = vmul.f32 %v734_v36, %v2775_v4  ;;  %1944 = vpow2.f32 %v2781_v16  ;;  %v3649_v57 = vld [vmem:[#allocation11_spill] sm:$0xff] }
 0x19d   : > { %v759_v49 = vadd.f32 %v757_v54, %v725_v35  ;;  %v803_v43 = vmul.f32 %v798_v23, %v2765_v1  ;;  %v804_v58 = vmul.f32 %v802_v60, %v2769_v6  ;;  %v735_v5 = vmul.f32 %v730_v39, %v2779_v26  ;;  %v3648_v6 = vld [vmem:[#allocation12_spill] sm:$0xff] }
 0x19e   : > { %v760_v0 = vadd.f32 %v758_v46, %v726_v8  ;;  %v738_v48 = vadd.f32 %v736_v53, %v692_v50  ;;  %v827_v44 = vmul.f32 %v2852_v42, %v3647_v34  ;;  %v768_v7 = vrot.slane %v748_v29, %v2460_v28  ;;  %v3650_v46 = vld [vmem:[#allocation17_spill] sm:$0xff] }
 0x19f   : > { %v805_v38 = vadd.f32 %v803_v43, %v759_v49  ;;  %v737_v52 = vadd.f32 %v735_v5, %v691_v10  ;;  %v814_v4 = vrot.slane %v782_v55, %v2460_v28  ;;  %v764_v16 = vrot.slane %v747_v18, %v2460_v28  ;;  %v922_v18 = vpop.permute.xlu0 %921  ;;  %v924_v36 = vpop.permute.xlu1 %923 }
 0x1a0   : > { %v806_v35 = vadd.f32 %v804_v58, %v760_v0  ;;  %v844_v1 = vrot.slane %v827_v44, %v2455_v24  ;;  %v770_v11 = vmul.f32 %v768_v7, %v3648_v6  ;;  %v810_v26 = vrot.slane %v781_v13, %v2460_v28  ;;  %v3652_v6 = vld [vmem:[#allocation19_spill] sm:$0xff] }
 0x1a1   : > { %v700_v8 = vadd.f32 %v2813_v20, %v2816_v2  ;;  %v839_v29 = vsel %vm471_vm6, %v2807_v37, %v2771_v25  ;;  %v769_v62 = vmul.f32 %v764_v16, %v3649_v57  ;;  %1946 = vpow2.f32 %v2784_v31 }
 0x1a2   : > { %v849_v55 = vmul.f32 %v844_v1, %v839_v29  ;;  %v772_v33 = vadd.f32 %v770_v11, %v738_v48  ;;  %v816_v50 = vmul.f32 %v814_v4, %v2795_v61  ;;  %1948 = vpow2.f32 %v2786_v17 }
 0x1a3   : > { %v771_v13 = vadd.f32 %v769_v62, %v737_v52  ;;  %v815_v30 = vmul.f32 %v810_v26, %v2791_v15  ;;  %v840_v20 = vsel %vm471_vm6, %v2828_v12, %v2802_v47  ;;  %v919_v2 = vmul.f32 %v2761_v41, %v2642_v21  ;;  %v926_v49 = vpop.permute.xlu0 %925  ;;  %v3651_v52 = vld [vmem:[#allocation18_spill] sm:$0xff] }
 0x1a4   : > { %v851_v31 = vadd.f32 %v849_v55, %v805_v38  ;;  %v818_v54 = vadd.f32 %v816_v50, %v772_v33  ;;  %v856_v23 = vrot.slane %v827_v44, %v2460_v28  ;;  %v745_v61 = vadd.f32 %v2830_v51, %v2824_v14 }
 0x1a5   : > { %v817_v17 = vadd.f32 %v815_v30, %v771_v13  ;;  %v746_v60 = vadd.f32 %v2835_v3, %v700_v8  ;;  %v920_v15 = vmul.f32 %v2820_v32, %v2645_v56  ;;  %v837_v53 = vsel %vm471_vm6, %v2771_v25, %v2807_v37  ;;  %v928_v37 = vpop.permute.xlu1 %927 }
 0x1a6   : > { %v1945_v39 = vpop.eup %1944  ;;  %v861_v10 = vmul.f32 %v856_v23, %v840_v20  ;;  %v779_v45 = vadd.f32 %v2840_v19, %v745_v61  ;;  %v838_v51 = vsel %vm471_vm6, %v2802_v47, %v2828_v12  ;;  %v936_v19 = vrot.slane %v919_v2, %v2455_v24 }
 0x1a7   : > { %v828_v21 = vmul.f32 %v1945_v39, %v3650_v46  ;;  %v780_v14 = vadd.f32 %v2847_v63, %v746_v60  ;;  %v940_v25 = vrot.slane %v920_v15, %v2455_v24  ;;  %v883_v63 = vsel %vm495_vm7, %v2845_v59, %v880_v9 }
 0x1a8   : > { %v863_v56 = vadd.f32 %v861_v10, %v817_v17  ;;  %v825_v3 = vadd.f32 %v2852_v42, %v779_v45  ;;  %v885_v47 = vsel %vm495_vm7, %v880_v9, %v2845_v59  ;;  %v929_v12 = vsel %vm519_vm8, %v922_v18, %v926_v49 }
 0x1a9   : > { %v848_v43 = vrot.slane %v828_v21, %v2455_v24  ;;  %v860_v58 = vrot.slane %v828_v21, %v2460_v28  ;;  %v826_v5 = vadd.f32 %v1945_v39, %v780_v14  ;;  %v931_v42 = vsel %vm519_vm8, %v926_v49, %v922_v18 }
 0x1aa   : > { %v884_v44 = vsel %vm495_vm7, %v2858_v27, %v882_v40  ;;  %v886_v7 = vsel %vm495_vm7, %v882_v40, %v2858_v27  ;;  %v930_v4 = vsel %vm519_vm8, %v924_v36, %v928_v37  ;;  %v932_v16 = vsel %vm519_vm8, %v928_v37, %v924_v36 }
 0x1ab   : > { %v1947_v0 = vpop.eup %1946  ;;  %v850_v48 = vmul.f32 %v848_v43, %v837_v53  ;;  %v862_v34 = vmul.f32 %v860_v58, %v838_v51  ;;  %v948_v40 = vrot.slane %v919_v2, %v2460_v28  ;;  %v942_v61 = vmul.f32 %v940_v25, %v931_v42 }
 0x1ac   : > { %v1949_v38 = vpop.eup %1948  ;;  %v873_v59 = vmul.f32 %v1947_v0, %v3651_v52  ;;  %v871_v9 = vadd.f32 %v1947_v0, %v825_v3 }
 0x1ad   : > { %v852_v1 = vadd.f32 %v850_v48, %v806_v35  ;;  %v874_v11 = vmul.f32 %v1949_v38, %v3652_v6  ;;  %v864_v26 = vadd.f32 %v862_v34, %v818_v54  ;;  %v872_v8 = vadd.f32 %v1949_v38, %v826_v5 }
 0x1ae   : > { %v890_v29 = vrot.slane %v873_v59, %v2455_v24  ;;  %v917_v57 = vadd.f32 %v2761_v41, %v871_v9  ;;  %v902_v27 = vrot.slane %v873_v59, %v2460_v28  ;;  %v952_v35 = vrot.slane %v920_v15, %v2460_v28 }
 0x1af   : > { %v894_v62 = vrot.slane %v874_v11, %v2455_v24  ;;  %v918_v18 = vadd.f32 %v2820_v32, %v872_v8  ;;  %v906_v55 = vrot.slane %v874_v11, %v2460_v28  ;;  %v953_v13 = vmul.f32 %v948_v40, %v930_v4 }
 0x1b0   : > { %v895_v33 = vmul.f32 %v890_v29, %v883_v63  ;;  %1950 = vrcp.f32 %v917_v57  ;;  %v907_v50 = vmul.f32 %v902_v27, %v884_v44  ;;  %v954_v41 = vmul.f32 %v952_v35, %v932_v16 }
 0x1b1   : > { %v896_v30 = vmul.f32 %v894_v62, %v885_v47  ;;  %1952 = vrcp.f32 %v918_v18  ;;  %v908_v20 = vmul.f32 %v906_v55, %v886_v7  ;;  %v941_v54 = vmul.f32 %v936_v19, %v929_v12 }
 0x1b2   : > { %v897_v36 = vadd.f32 %v895_v33, %v851_v31  ;;  %v909_v23 = vadd.f32 %v907_v50, %v863_v56  ;;  %v1009_v31 = vpop.permute.xlu0 %1008  ;;  %v3653_v33 = vld [vmem:[#allocation14_spill] sm:$0xff] }
 0x1b3   : > { %v898_v2 = vadd.f32 %v896_v30, %v852_v1  ;;  %v910_v17 = vadd.f32 %v908_v20, %v864_v26  ;;  %v1042_v26 = vstv %s2978_s23  ;;  %s256_s23 = scalar_lea.vmem [#allocation7], %s1803_s9 }
 0x1b4   : > { %v943_v60 = vadd.f32 %v941_v54, %v897_v36  ;;  %v955_v32 = vadd.f32 %v953_v13, %v909_v23  ;;  %v984_v35 = vpop.permute.xlu1 %983  ;;  %v3654_v13 = vld [vmem:[#allocation15_spill] sm:$0xff] }
 0x1b5   : > { %v944_v39 = vadd.f32 %v942_v61, %v898_v2  ;;  %v956_v10 = vadd.f32 %v954_v41, %v910_v17  ;;  %v986_v50 = vmul.f32 %v984_v35, %v3653_v33  ;;  %v987_v30 = vmul.f32 %v984_v35, %v3654_v13  ;;  %v1820_v33 = vld [vmem:[%s3603_s2 + $0x6] sm:$0x3] }
 0x1b7   : > { %v988_v20 = vrot.slane %v986_v50, 4  ;;  %v994_v41 = vrot.slane %v987_v30, 4 }
 0x1b9   : > { %v989_v23 = vadd.f32 %v988_v20, %v986_v50  ;;  %v995_v2 = vadd.f32 %v994_v41, %v987_v30 }
 0x1ba   : > { %v1951_v45 = vpop.eup %1950 }
 0x1bb   : > { %v1953_v15 = vpop.eup %1952  ;;  %v962_v46 = vrot.slane %v1951_v45, %v2455_v24  ;;  %v972_v21 = vrot.slane %v1951_v45, %v2460_v28  ;;  %v990_v45 = vrot.slane %v989_v23, 2 }
 0x1bc   : > { %v966_v53 = vrot.slane %v1953_v15, %v2455_v24  ;;  %v976_v49 = vrot.slane %v1953_v15, %v2460_v28  ;;  %v996_v15 = vrot.slane %v995_v2, 2 }
 0x1bd   : > { %v2962_v14 = vmul.f32 %v962_v46, %v943_v60  ;;  %v2964_v51 = vmul.f32 %v972_v21, %v955_v32 }
 0x1be   : > { %v2966_v56 = vmul.f32 %v966_v53, %v944_v39  ;;  %v2968_v3 = vmul.f32 %v976_v49, %v956_v10  ;;  %v991_v53 = vadd.f32 %v990_v45, %v989_v23  ;;  %v997_v49 = vadd.f32 %v996_v15, %v995_v2 }
 0x1bf   : > { %v1011_v19 = vmul.f32 %v1009_v31, %v2962_v14  ;;  %v1025_v43 = vmul.f32 %v1009_v31, %v2964_v51  ;;  %1279 = vrot.lane.b32.xlu0 %v2962_v14, %s2124_s12  ;;  %1281 = vrot.lane.b32.xlu1 %v2964_v51, %s2124_s12  ;;  %v3134_v23 = vrot.slane %v1820_v33, %v2455_v24 }
 0x1c0   : > { %v1012_v58 = vmul.f32 %v1009_v31, %v2966_v56  ;;  %v1026_v5 = vmul.f32 %v1009_v31, %v2968_v3  ;;  %v3143_v15 = vrot.slane %v1820_v33, %v2460_v28 }
 0x1c1   : > { %v1013_v25 = vrot.slane %v1011_v19, 4  ;;  %v1027_v37 = vrot.slane %v1025_v43, 4 }
 0x1c2   : > { %v1019_v63 = vrot.slane %v1012_v58, 4  ;;  %v1033_v47 = vrot.slane %v1026_v5, 4 }
 0x1c3   : > { %v1014_v12 = vadd.f32 %v1013_v25, %v1011_v19  ;;  %v1028_v42 = vadd.f32 %v1027_v37, %v1025_v43  ;;  %1283 = vrot.lane.b32.xlu0 %v2966_v56, %s2124_s12  ;;  %1285 = vrot.lane.b32.xlu1 %v2968_v3, %s2124_s12  ;;  %v992_v37 = vrot.slane %v991_v53, 1 }
 0x1c4   : > { %v1020_v0 = vadd.f32 %v1019_v63, %v1012_v58  ;;  %v1034_v48 = vadd.f32 %v1033_v47, %v1026_v5  ;;  %v998_v63 = vrot.slane %v997_v49, 1 }
 0x1c5   : > { %v1015_v34 = vrot.slane %v1014_v12, 2  ;;  %v1029_v44 = vrot.slane %v1028_v42, 2 }
 0x1c6   : > { %v1021_v7 = vrot.slane %v1020_v0, 2  ;;  %v1035_v38 = vrot.slane %v1034_v48, 2 }
 0x1c7   : > { %v1016_v52 = vadd.f32 %v1015_v34, %v1014_v12  ;;  %v1030_v59 = vadd.f32 %v1029_v44, %v1028_v42  ;;  %1325 = vrot.lane.b32.xlu0 %v2962_v14, %s2125_s26  ;;  %1327 = vrot.lane.b32.xlu1 %v2964_v51, %s2125_s26  ;;  %v993_v42 = vadd.f32 %v992_v37, %v991_v53  ;;  %v1054_v44 = vld [vmem:[%s3603_s2] sm:$0x3] }
 0x1c8   : > { %v1022_v9 = vadd.f32 %v1021_v7, %v1020_v0  ;;  %v1036_v4 = vadd.f32 %v1035_v38, %v1034_v48  ;;  %v1001_v0 = vstv %s1815_s13  ;;  %v999_v48 = vadd.f32 %v998_v63, %v997_v49  ;;  %v1818_v38 = vld [vmem:[%s3603_s2 + $0x2] sm:$0x3] }
 0x1c9   : > { %v1017_v16 = vrot.slane %v1016_v52, 1  ;;  %v1031_v1 = vrot.slane %v1030_v59, 1 }
 0x1ca   : > { %v1023_v6 = vrot.slane %v1022_v9, 1  ;;  %v1037_v11 = vrot.slane %v1036_v4, 1 }
 0x1cb   : > { %v1018_v8 = vadd.f32 %v1017_v16, %v1016_v52  ;;  %v1032_v29 = vadd.f32 %v1031_v1, %v1030_v59  ;;  %1329 = vrot.lane.b32.xlu0 %v2966_v56, %s2125_s26  ;;  %1331 = vrot.lane.b32.xlu1 %v2968_v3, %s2125_s26  ;;  %v3085_v52 = vadd.f32 %v1001_v0, %v993_v42 }
 0x1cc   : > { %v1024_v57 = vadd.f32 %v1023_v6, %v1022_v9  ;;  %v1038_v27 = vadd.f32 %v1037_v11, %v1036_v4  ;;  %v1819_v4 = vld [vmem:[%s3603_s2 + $0x4] sm:$0x3]  ;;  %v3094_v16 = vadd.f32 %v1001_v0, %v999_v48  ;;  %v3102_v11 = vrot.slane %v1054_v44, %v2455_v24 }
 0x1cd   : > { %v1039_v40 = vsel %vm322_vm1, %v1018_v8, %v1032_v29  ;;  %v3108_v8 = vrot.slane %v1818_v38, %v2455_v24  ;;  %v3116_v35 = vrot.slane %v1819_v4, %v2455_v24  ;;  %v3128_v41 = vrot.slane %v1819_v4, %v2460_v28 }
 0x1ce   : > { %v1040_v62 = vsel %vm322_vm1, %v1024_v57, %v1038_v27  ;;  %v2991_v18 = vadd.f32 %v1042_v26, %v1039_v40  ;;  %v3111_v57 = vrot.slane %v1818_v38, %v2460_v28 }
 0x1cf   : > { %v2993_v55 = vadd.f32 %v1042_v26, %v1040_v62  ;;  %v3105_v26 = vrot.slane %v1054_v44, %v2460_v28 }
 0x1d0   : > { %1045 = vrot.lane.b32.xlu0 %v2991_v18, %s2124_s12  ;;  %v1140_v0 = vmul.f32 %v2991_v18, %v3085_v52 }
 0x1d1   : > { %1047 = vrot.lane.b32.xlu1 %v2993_v55, %s2124_s12  ;;  %s1831_s12 = sshll.u32 %s2185_s22, 9  ;;  %s1698_s22 = scalar_lea.sflag [#allocation4], %s2291_s14 }
 0x1d4   : > { %1068 = vrot.lane.b32.xlu0 %v2991_v18, %s2125_s26 }
 0x1d5   : > { %1070 = vrot.lane.b32.xlu1 %v2993_v55, %s2125_s26  ;;  %s1711_s26 = sshll.u32 %s256_s23, 4  ;;  %s3556_s26 = int_to_ptr.vmem [resolvable:$true] %s1711_s26 }
 0x1d8   : > { %1092 = vrot.lane.b32.xlu0 %v2991_v18, %s2126_s28 }
 0x1d9   : > { %1094 = vrot.lane.b32.xlu1 %v2993_v55, %s2126_s28 }
 0x1dc   : > { %1116 = vrot.lane.b32.xlu0 %v2991_v18, %s2127_s11 }
 0x1dd   : > { %1118 = vrot.lane.b32.xlu1 %v2993_v55, %s2127_s11 }
 0x1e0   : > { %1157 = vrot.lane.b32.xlu0 %v2991_v18, %s2128_s10 }
 0x1e1   : > { %1159 = vrot.lane.b32.xlu1 %v2993_v55, %s2128_s10 }
 0x1e4   : > { %1181 = vrot.lane.b32.xlu0 %v2991_v18, %s2129_s15 }
 0x1e5   : > { %1183 = vrot.lane.b32.xlu1 %v2993_v55, %s2129_s15 }
 0x1e8   : > { %1205 = vrot.lane.b32.xlu0 %v2991_v18, %s2130_s16 }
 0x1e9   : > { %1207 = vrot.lane.b32.xlu1 %v2993_v55, %s2130_s16 }
 0x1ec   : > { %1229 = vrot.lane.b32.xlu0 %v2991_v18, %s2131_s7  ;;  %v1141_v18 = vmul.f32 %v2993_v55, %v3094_v16 }
 0x1ed   : > { %1231 = vrot.lane.b32.xlu1 %v2993_v55, %s2131_s7 }
 0x1f0   : > { %1371 = vrot.lane.b32.xlu0 %v2962_v14, %s2126_s28 }
 0x1f1   : > { %1373 = vrot.lane.b32.xlu1 %v2964_v51, %s2126_s28 }
 0x1f4   : > { %1375 = vrot.lane.b32.xlu0 %v2966_v56, %s2126_s28 }
 0x1f5   : > { %1377 = vrot.lane.b32.xlu1 %v2968_v3, %s2126_s28 }
 0x1f8   : > { %1417 = vrot.lane.b32.xlu0 %v2962_v14, %s2127_s11 }
 0x1f9   : > { %1419 = vrot.lane.b32.xlu1 %v2964_v51, %s2127_s11 }
 0x1fc   : > { %1421 = vrot.lane.b32.xlu0 %v2966_v56, %s2127_s11 }
 0x1fd   : > { %1423 = vrot.lane.b32.xlu1 %v2968_v3, %s2127_s11 }
 0x200   : > { %1497 = vrot.lane.b32.xlu0 %v2962_v14, %s2128_s10 }
 0x201   : > { %1499 = vrot.lane.b32.xlu1 %v2964_v51, %s2128_s10 }
 0x204   : > { %1501 = vrot.lane.b32.xlu0 %v2966_v56, %s2128_s10 }
 0x205   : > { %1503 = vrot.lane.b32.xlu1 %v2968_v3, %s2128_s10 }
 0x208   : > { %1543 = vrot.lane.b32.xlu0 %v2962_v14, %s2129_s15 }
 0x209   : > { %1545 = vrot.lane.b32.xlu1 %v2964_v51, %s2129_s15 }
 0x20c   : > { %1547 = vrot.lane.b32.xlu0 %v2966_v56, %s2129_s15 }
 0x20d   : > { %1549 = vrot.lane.b32.xlu1 %v2968_v3, %s2129_s15  ;;  %s3554_s15 = scalar_lea.hbm %s3606_s5, %s1831_s12 }
 0x210   : > { %1589 = vrot.lane.b32.xlu0 %v2962_v14, %s2130_s16 }
 0x211   : > { %1591 = vrot.lane.b32.xlu1 %v2964_v51, %s2130_s16 }
 0x214   : > { %1593 = vrot.lane.b32.xlu0 %v2966_v56, %s2130_s16 }
 0x215   : > { %1595 = vrot.lane.b32.xlu1 %v2968_v3, %s2130_s16  ;;  %s2039_s16 = scalar_lea.vmem %s3556_s26, 512 }
 0x216   : > { %p2040_p5 = scmp.ne.s32.totalorder %s3556_s26, %s2039_s16 }
 0x218   : > { %1635 = vrot.lane.b32.xlu0 %v2962_v14, %s2131_s7  ;;  %p2041_p8 = pnand %p2040_p5, %p3673_p12 }
 0x219   : > { %1637 = vrot.lane.b32.xlu1 %v2964_v51, %s2131_s7 }
 0x21a   : > { %p2042_p9 = pneg %p2041_p8 }
 0x21c   : > { %1639 = vrot.lane.b32.xlu0 %v2966_v56, %s2131_s7 }
 0x21d   : > { %1641 = vrot.lane.b32.xlu1 %v2968_v3, %s2131_s7  ;;  %s2132_s7 = smov [#allocation7]  }
 0x21e   : > { %s2043_s13 = sshll.u32 %s2132_s7, 4  ;;  %s2044_s13 = int_to_ptr.vmem [resolvable:$false] %s2043_s13 }
 0x21f   : > { %s2045_s29 = scalar_lea.vmem %s2044_s13, 1024  ;;  %p2046_p10 = scmp.lt.s32.totalorder %s3556_s26, %s2044_s13 }
 0x220   : > { %p2047_p1 = scmp.lt.s32.totalorder %s2045_s29, %s2039_s16 }
 0x222   : > { %p2048_p4 = por %p2047_p1, %p2046_p10 }
 0x224   : > { %p2049_p11 = pnand %p2048_p4, %p2042_p9 }
 0x231   : > { %v1280_v36 = vpop.permute.xlu0 %1279  ;;  %v1282_v54 = vpop.permute.xlu1 %1281 }
 0x235   : > { %v1284_v61 = vpop.permute.xlu0 %1283  ;;  %v1286_v17 = vpop.permute.xlu1 %1285 }
 0x236   : > { %v3048_v60 = vsel %vm1049_vm9, %v1280_v36, %v1284_v61  ;;  %v3052_v32 = vsel %vm1049_vm9, %v1284_v61, %v1280_v36  ;;  %v3056_v39 = vsel %vm1049_vm9, %v1282_v54, %v1286_v17  ;;  %v3060_v10 = vsel %vm1049_vm9, %v1286_v17, %v1282_v54 }
 0x239   : > { %v1326_v46 = vpop.permute.xlu0 %1325  ;;  %v1328_v21 = vpop.permute.xlu1 %1327 }
 0x23d   : > { %v1330_v31 = vpop.permute.xlu0 %1329  ;;  %v1332_v19 = vpop.permute.xlu1 %1331 }
 0x23e   : > { %v3065_v43 = vsel %vm1072_vm10, %v1326_v46, %v1330_v31  ;;  %v3069_v58 = vsel %vm1072_vm10, %v1330_v31, %v1326_v46  ;;  %v3073_v5 = vsel %vm1072_vm10, %v1328_v21, %v1332_v19  ;;  %v3077_v25 = vsel %vm1072_vm10, %v1332_v19, %v1328_v21  ;;  %v1821_v46 = vld [vmem:[%s3603_s2 + $0x8] sm:$0x3] }
 0x242   : > { %v1046_v47 = vpop.permute.xlu0 %1045 }
 0x243   : > { %v1048_v12 = vpop.permute.xlu1 %1047 }
 0x244   : > { %v1050_v1 = vsel %vm1049_vm9, %v1046_v47, %v1048_v12  ;;  %v1051_v6 = vsel %vm1049_vm9, %v1048_v12, %v1046_v47  ;;  %v3168_v12 = vrot.slane %v1821_v46, %v2455_v24 }
 0x245   : > { %v1052_v50 = vmul.f32 %v1051_v6, %v3085_v52  ;;  %v1053_v13 = vmul.f32 %v1050_v1, %v3094_v16 }
 0x246   : > { %v1069_v34 = vpop.permute.xlu0 %1068 }
 0x247   : > { %v1071_v7 = vpop.permute.xlu1 %1070  ;;  %v3150_v21 = vmul.f32 %v3102_v11, %v1052_v50  ;;  %v3153_v53 = vmul.f32 %v3105_v26, %v1053_v13 }
 0x248   : > { %v1073_v59 = vsel %vm1072_vm10, %v1069_v34, %v1071_v7  ;;  %v1074_v9 = vsel %vm1072_vm10, %v1071_v7, %v1069_v34 }
 0x249   : > { %v1075_v27 = vmul.f32 %v1074_v9, %v3085_v52  ;;  %v1076_v40 = vmul.f32 %v1073_v59, %v3094_v16  ;;  %v1822_v59 = vld [vmem:[%s3603_s2 + $0xa] sm:$0x3]  ;;  %v3188_v9 = vrot.slane %v1821_v46, %v2460_v28 }
 0x24a   : > { %v1093_v29 = vpop.permute.xlu0 %1092  ;;  %v3201_v55 = vrot.slane %v1822_v59, %v2455_v24 }
 0x24b   : > { %v1095_v62 = vpop.permute.xlu1 %1094  ;;  %v3137_v61 = vmul.f32 %v3108_v8, %v1075_v27  ;;  %v3140_v17 = vmul.f32 %v3111_v57, %v1076_v40  ;;  %v1823_v27 = vld [vmem:[%s3603_s2 + $0xc] sm:$0x3]  ;;  %v3204_v40 = vrot.slane %v1822_v59, %v2460_v28 }
 0x24c   : > { %v1097_v30 = vsel %vm1096_vm11, %v1093_v29, %v1095_v62  ;;  %v1098_v20 = vsel %vm1096_vm11, %v1095_v62, %v1093_v29  ;;  %v3207_v62 = vmul.f32 %v3168_v12, %v1140_v0 }
 0x24d   : > { %v1099_v36 = vmul.f32 %v1097_v30, %v3085_v52  ;;  %v1100_v54 = vmul.f32 %v1098_v20, %v3094_v16  ;;  %v1253_v48 = vmax.f32 %v3150_v21, %v3137_v61  ;;  %v1254_v34 = vmax.f32 %v3153_v53, %v3140_v17 }
 0x24e   : > { %v1117_v2 = vpop.permute.xlu0 %1116 }
 0x24f   : > { %v1119_v45 = vpop.permute.xlu1 %1118  ;;  %v3160_v19 = vmul.f32 %v3116_v35, %v1099_v36  ;;  %v3163_v37 = vmul.f32 %v3128_v41, %v1100_v54  ;;  %v1824_v54 = vld [vmem:[%s3603_s2 + $0xe] sm:$0x3] }
 0x250   : > { %v1121_v49 = vsel %vm1120_vm12, %v1117_v2, %v1119_v45  ;;  %v1122_v31 = vsel %vm1120_vm12, %v1119_v45, %v1117_v2  ;;  %v3217_v2 = vmul.f32 %v3188_v9, %v1141_v18  ;;  %v3220_v45 = vrot.slane %v1823_v27, %v2455_v24 }
 0x251   : > { %v1123_v63 = vmul.f32 %v1122_v31, %v3085_v52  ;;  %v1124_v47 = vmul.f32 %v1121_v49, %v3094_v16  ;;  %v1255_v6 = vmax.f32 %v1253_v48, %v3160_v19  ;;  %v1256_v29 = vmax.f32 %v1254_v34, %v3163_v37 }
 0x252   : > { %v1158_v42 = vpop.permute.xlu0 %1157  ;;  %3655 = vst [vmem:[#allocation13_spill] sm:$0xff] %v3220_v45  ;;  %v3227_v31 = vrot.slane %v1823_v27, %v2460_v28  ;;  %v3236_v0 = vrot.slane %v1824_v54, %v2460_v28 }
 0x253   : > { %v3177_v44 = vmul.f32 %v3134_v23, %v1123_v63  ;;  %v3180_v7 = vmul.f32 %v3143_v15, %v1124_v47  ;;  %v1160_v38 = vpop.permute.xlu1 %1159 }
 0x254   : > { %v1162_v4 = vsel %vm1161_vm13, %v1158_v42, %v1160_v38  ;;  %v1163_v1 = vsel %vm1161_vm13, %v1160_v38, %v1158_v42  ;;  %3656 = vst [vmem:[#allocation16_spill] sm:$0xff] %v3227_v31  ;;  %v3233_v42 = vrot.slane %v1824_v54, %v2455_v24  ;;  %3658 = vst [vmem:[#allocation11_spill] sm:$0xff] %v3236_v0 }
 0x255   : > { %v1257_v50 = vmax.f32 %v1255_v6, %v3177_v44  ;;  %v1258_v13 = vmax.f32 %v1256_v29, %v3180_v7  ;;  %v1164_v30 = vmul.f32 %v1162_v4, %v3085_v52  ;;  %v1165_v20 = vmul.f32 %v1163_v1, %v3094_v16  ;;  %v1825_v1 = vld [vmem:[%s3603_s2 + $0x10] sm:$0x3] }
 0x256   : > { %v1182_v33 = vpop.permute.xlu0 %1181  ;;  %3657 = vst [vmem:[#allocation12_spill] sm:$0xff] %v3233_v42 }
 0x257   : > { %v1184_v36 = vpop.permute.xlu1 %1183  ;;  %v1260_v34 = vmax.f32 %v1258_v13, %v3217_v2  ;;  %v3240_v38 = vmul.f32 %v3201_v55, %v1164_v30  ;;  %v3243_v59 = vmul.f32 %v3204_v40, %v1165_v20  ;;  %v1259_v18 = vmax.f32 %v1257_v50, %v3207_v62 }
 0x258   : > { %v1186_v46 = vsel %vm1185_vm14, %v1182_v33, %v1184_v36  ;;  %v1187_v49 = vsel %vm1185_vm14, %v1184_v36, %v1182_v33  ;;  %v3263_v30 = vrot.slane %v1825_v1, %v2455_v24  ;;  %v3266_v20 = vrot.slane %v1825_v1, %v2460_v28 }
 0x259   : > { %v1188_v63 = vmul.f32 %v1187_v49, %v3085_v52  ;;  %v1189_v47 = vmul.f32 %v1186_v46, %v3094_v16  ;;  %v1261_v54 = vmax.f32 %v1259_v18, %v3240_v38  ;;  %v1262_v46 = vmax.f32 %v1260_v34, %v3243_v59 }
 0x25a   : > { %v1206_v48 = vpop.permute.xlu0 %1205  ;;  %3659 = vst [vmem:[#allocation17_spill] sm:$0xff] %v3263_v30  ;;  %3660 = vst [vmem:[#allocation18_spill] sm:$0xff] %v3266_v20 }
 0x25b   : > { %v1208_v4 = vpop.permute.xlu1 %1207  ;;  %v3255_v27 = vmul.f32 %v3220_v45, %v1188_v63  ;;  %v3258_v33 = vmul.f32 %v3227_v31, %v1189_v47 }
 0x25c   : > { %v1210_v6 = vsel %vm1209_vm15, %v1206_v48, %v1208_v4  ;;  %v1211_v29 = vsel %vm1209_vm15, %v1208_v4, %v1206_v48 }
 0x25d   : > { %v1212_v50 = vmul.f32 %v1210_v6, %v3085_v52  ;;  %v1213_v13 = vmul.f32 %v1211_v29, %v3094_v16  ;;  %v1263_v1 = vmax.f32 %v1261_v54, %v3255_v27  ;;  %v1264_v6 = vmax.f32 %v1262_v46, %v3258_v33 }
 0x25e   : > { %v1230_v36 = vpop.permute.xlu0 %1229 }
 0x25f   : > { %v3271_v49 = vmul.f32 %v3233_v42, %v1212_v50  ;;  %v3274_v63 = vmul.f32 %v3236_v0, %v1213_v13  ;;  %v1232_v47 = vpop.permute.xlu1 %1231 }
 0x260   : > { %v1234_v48 = vsel %vm1233_vm0, %v1230_v36, %v1232_v47  ;;  %v1235_v4 = vsel %vm1233_vm0, %v1232_v47, %v1230_v36 }
 0x261   : > { %v1236_v18 = vmul.f32 %v1234_v48, %v3085_v52  ;;  %v1237_v34 = vmul.f32 %v1235_v4, %v3094_v16  ;;  %v1265_v50 = vmax.f32 %v1263_v1, %v3271_v49  ;;  %v1266_v13 = vmax.f32 %v1264_v6, %v3274_v63 }
 0x262   : > { %v1372_v29 = vpop.permute.xlu0 %1371 }
 0x263   : > { %v1251_v0 = vmul.f32 %v3263_v30, %v1236_v18  ;;  %v1252_v42 = vmul.f32 %v3266_v20, %v1237_v34  ;;  %v1374_v31 = vpop.permute.xlu1 %1373 }
 0x265   : > { %v3288_v45 = vmax.f32 %v1265_v50, %v1251_v0  ;;  %v3290_v36 = vmax.f32 %v1266_v13, %v1252_v42 }
 0x266   : > { %v1376_v54 = vpop.permute.xlu0 %1375 }
 0x267   : > { %v1625_v46 = vsub.f32 %v1251_v0, %v3288_v45  ;;  %v1378_v52 = vpop.permute.xlu1 %1377  ;;  %v1269_v16 = vsub.f32 %v3150_v21, %v3288_v45  ;;  %v1270_v47 = vsub.f32 %v3153_v53, %v3290_v36  ;;  %v1315_v48 = vsub.f32 %v3137_v61, %v3288_v45 }
 0x268   : > { %v1316_v4 = vsub.f32 %v3140_v17, %v3290_v36  ;;  %v1361_v18 = vsub.f32 %v3160_v19, %v3288_v45  ;;  %v1362_v0 = vsub.f32 %v3163_v37, %v3290_v36  ;;  %v1626_v21 = vsub.f32 %v1252_v42, %v3290_v36 }
 0x269   : > { %v1627_v1 = vmul.f32 1.442695, %v1625_v46  ;;  %v1271_v6 = vmul.f32 1.442695, %v1269_v16  ;;  %v1273_v34 = vmul.f32 1.442695, %v1270_v47  ;;  %v1407_v61 = vsub.f32 %v3177_v44, %v3288_v45 }
 0x26a   : > { %v1418_v50 = vpop.permute.xlu0 %1417  ;;  %v1317_v13 = vmul.f32 1.442695, %v1315_v48  ;;  %v1319_v20 = vmul.f32 1.442695, %v1316_v4  ;;  %v1363_v17 = vmul.f32 1.442695, %v1361_v18  ;;  %v1408_v46 = vsub.f32 %v3180_v7, %v3290_v36 }
 0x26b   : > { %v1420_v53 = vpop.permute.xlu1 %1419  ;;  %1954 = vpow2.f32 %v1627_v1  ;;  %v1365_v19 = vmul.f32 1.442695, %v1362_v0  ;;  %v1453_v37 = vsub.f32 %v3207_v62, %v3288_v45  ;;  %v1629_v47 = vmul.f32 1.442695, %v1626_v21 }
 0x26c   : > { %1956 = vpow2.f32 %v1271_v6  ;;  %v1454_v48 = vsub.f32 %v3217_v2, %v3290_v36  ;;  %v1409_v4 = vmul.f32 1.442695, %v1407_v61  ;;  %v1487_v44 = vsub.f32 %v3240_v38, %v3288_v45 }
 0x26d   : > { %1958 = vpow2.f32 %v1273_v34  ;;  %v3318_v7 = vsel %vm1096_vm11, %v1374_v31, %v1378_v52  ;;  %v1411_v1 = vmul.f32 1.442695, %v1408_v46  ;;  %v1488_v62 = vsub.f32 %v3243_v59, %v3290_v36 }
 0x26e   : > { %v1422_v16 = vpop.permute.xlu0 %1421  ;;  %1960 = vpow2.f32 %v1317_v13  ;;  %v3324_v6 = vsel %vm1096_vm11, %v1378_v52, %v1374_v31  ;;  %v1533_v18 = vsub.f32 %v3255_v27, %v3288_v45  ;;  %v1457_v34 = vmul.f32 1.442695, %v1454_v48 }
 0x26f   : > { %v1424_v42 = vpop.permute.xlu1 %1423  ;;  %1962 = vpow2.f32 %v1319_v20  ;;  %v1455_v20 = vmul.f32 1.442695, %v1453_v37  ;;  %v1534_v0 = vsub.f32 %v3258_v33, %v3290_v36  ;;  %v1579_v21 = vsub.f32 %v3271_v49, %v3288_v45 }
 0x270   : > { %1964 = vpow2.f32 %v1363_v17  ;;  %v3334_v59 = vsel %vm1096_vm11, %v1372_v29, %v1376_v54  ;;  %v1489_v31 = vmul.f32 1.442695, %v1487_v44  ;;  %v1580_v52 = vsub.f32 %v3274_v63, %v3290_v36 }
 0x271   : > { %1966 = vpow2.f32 %v1365_v19  ;;  %v3340_v27 = vsel %vm1096_vm11, %v1376_v54, %v1372_v29  ;;  %v3344_v33 = vsel %vm1120_vm12, %v1418_v50, %v1422_v16  ;;  %v1491_v13 = vmul.f32 1.442695, %v1488_v62 }
 0x272   : > { %v1498_v2 = vpop.permute.xlu0 %1497  ;;  %1968 = vpow2.f32 %v1629_v47  ;;  %v3350_v49 = vsel %vm1120_vm12, %v1420_v53, %v1424_v42  ;;  %v3354_v61 = vsel %vm1120_vm12, %v1422_v16, %v1418_v50  ;;  %v1535_v29 = vmul.f32 1.442695, %v1533_v18 }
 0x273   : > { %v1500_v38 = vpop.permute.xlu1 %1499  ;;  %1970 = vpow2.f32 %v1409_v4  ;;  %v3358_v54 = vsel %vm1120_vm12, %v1424_v42, %v1420_v53  ;;  %v3360_v46 = vmul.f32 1.442695, %v1534_v0  ;;  %v3362_v19 = vmul.f32 1.442695, %v1579_v21 }
 0x274   : > { %1972 = vpow2.f32 %v1411_v1  ;;  %v3369_v16 = vmul.f32 1.442695, %v1580_v52 }
 0x275   : > { %v3346_v45 = vpop.eup %1954  ;;  %1974 = vpow2.f32 %v1455_v20 }
 0x276   : > { %3661 = vst [vmem:[#allocation19_spill] sm:$0xff] %v3346_v45  ;;  %v1502_v63 = vpop.permute.xlu0 %1501  ;;  %v1957_v36 = vpop.eup %1956  ;;  %1976 = vpow2.f32 %v1457_v34  ;;  %3662 = vst [vmem:[#allocation14_spill] sm:$0xff] %v3369_v16 }
 0x277   : > { %v1504_v17 = vpop.permute.xlu1 %1503  ;;  %v1959_v37 = vpop.eup %1958  ;;  %v1277_v47 = vmul.f32 %v1957_v36, %v3102_v11  ;;  %1978 = vpow2.f32 %v1489_v31  ;;  %v3367_v50 = vsel %vm1161_vm13, %v1498_v2, %v1502_v63  ;;  %v3378_v4 = vsel %vm1161_vm13, %v1502_v63, %v1498_v2 }
 0x278   : > { %v1961_v48 = vpop.eup %1960  ;;  %v1278_v53 = vmul.f32 %v1959_v37, %v3105_v26  ;;  %1980 = vpow2.f32 %v1491_v13  ;;  %v3374_v42 = vsel %vm1161_vm13, %v1500_v38, %v1504_v17  ;;  %v3384_v62 = vsel %vm1161_vm13, %v1504_v17, %v1500_v38 }
 0x279   : > { %v1963_v11 = vpop.eup %1962  ;;  %v1306_v44 = vrot.slane %v1277_v47, %v2460_v28  ;;  %v1323_v1 = vmul.f32 %v1961_v48, %v3108_v8  ;;  %1982 = vpow2.f32 %v1535_v29  ;;  %v1294_v0 = vrot.slane %v1277_v47, %v2455_v24 }
 0x27a   : > { %v3386_v20 = vpop.permute.xlu0 %1543  ;;  %v1965_v26 = vpop.eup %1964  ;;  %v1310_v18 = vrot.slane %v1278_v53, %v2460_v28  ;;  %v1324_v34 = vmul.f32 %v1963_v11, %v3111_v57  ;;  %v1298_v2 = vrot.slane %v1278_v53, %v2455_v24  ;;  %v1321_v52 = vadd.f32 %v1961_v48, %v1957_v36 }
 0x27b   : > { %v3392_v21 = vpop.permute.xlu1 %1545  ;;  %v1967_v31 = vpop.eup %1966  ;;  %v1311_v8 = vmul.f32 %v1306_v44, %v3060_v10  ;;  %v1352_v38 = vrot.slane %v1323_v1, %v2460_v28  ;;  %v1369_v13 = vmul.f32 %v1965_v26, %v3116_v35  ;;  %v1322_v17 = vadd.f32 %v1963_v11, %v1959_v37 }
 0x27c   : > { %v3397_v63 = vpop.eup %1968  ;;  %v1312_v29 = vmul.f32 %v1310_v18, %v3056_v39  ;;  %v1356_v57 = vrot.slane %v1324_v34, %v2460_v28  ;;  %v1370_v53 = vmul.f32 %v1967_v31, %v3128_v41  ;;  %v1300_v36 = vmul.f32 %v1298_v2, %v3048_v60 }
 0x27d   : > { %3663 = vst [vmem:[#allocation15_spill] sm:$0xff] %v3397_v63  ;;  %v3402_v47 = vpop.eup %1970  ;;  %v1357_v45 = vmul.f32 %v1352_v38, %v3077_v25  ;;  %v1398_v10 = vrot.slane %v1369_v13, %v2460_v28  ;;  %v1344_v48 = vrot.slane %v1324_v34, %v2455_v24  ;;  %v1299_v41 = vmul.f32 %v1294_v0, %v3052_v32 }
 0x27e   : > { %v3408_v35 = vpop.eup %1972  ;;  %v1358_v44 = vmul.f32 %v1356_v57, %v3073_v5  ;;  %v1402_v39 = vrot.slane %v1370_v53, %v2460_v28  ;;  %v1390_v37 = vrot.slane %v1370_v53, %v2455_v24  ;;  %v3416_v18 = vpop.permute.xlu0 %1547  ;;  %v1340_v2 = vrot.slane %v1323_v1, %v2455_v24 }
 0x27f   : > { %v3414_v11 = vpop.permute.xlu1 %1549  ;;  %v3418_v25 = vpop.eup %1974  ;;  %v1359_v38 = vadd.f32 %v1357_v45, %v1311_v8  ;;  %v1403_v60 = vmul.f32 %v1398_v10, %v3318_v7  ;;  %v1346_v34 = vmul.f32 %v1344_v48, %v3065_v43  ;;  %v1367_v63 = vadd.f32 %v1965_v26, %v1321_v52 }
 0x280   : > { %v3423_v5 = vpop.eup %1976  ;;  %v1360_v57 = vadd.f32 %v1358_v44, %v1312_v29  ;;  %v1404_v53 = vmul.f32 %v1402_v39, %v3324_v6  ;;  %v1386_v32 = vrot.slane %v1369_v13, %v2455_v24  ;;  %v1345_v45 = vmul.f32 %v1340_v2, %v3069_v58 }
 0x281   : > { %v3427_v0 = vpop.eup %1978  ;;  %v1405_v30 = vadd.f32 %v1403_v60, %v1359_v38  ;;  %v1348_v16 = vadd.f32 %v1346_v34, %v1300_v36  ;;  %v1392_v7 = vmul.f32 %v1390_v37, %v3340_v27  ;;  %v1368_v43 = vadd.f32 %v1967_v31, %v1322_v17 }
 0x282   : > { %v3431_v8 = vpop.eup %1980  ;;  %v1406_v1 = vadd.f32 %v1404_v53, %v1360_v57  ;;  %v1391_v10 = vmul.f32 %v1386_v32, %v3334_v59  ;;  %v1415_v26 = vmul.f32 %v3402_v47, %v3134_v23  ;;  %v1347_v13 = vadd.f32 %v1345_v45, %v1299_v41  ;;  %v3450_v36 = vpop.permute.xlu0 %1589 }
 0x283   : > { %v3436_v6 = vpop.permute.xlu1 %1591  ;;  %v3438_v52 = vpop.eup %1982  ;;  %v1394_v29 = vadd.f32 %v1392_v7, %v1348_v16  ;;  %v1416_v58 = vmul.f32 %v3408_v35, %v3143_v15  ;;  %v1461_v27 = vmul.f32 %v3418_v25, %v3168_v12  ;;  %v1462_v59 = vmul.f32 %v3423_v5, %v3188_v9 }
 0x284   : > { %v1444_v31 = vrot.slane %v1415_v26, %v2460_v28  ;;  %v1432_v17 = vrot.slane %v1415_v26, %v2455_v24  ;;  %v1495_v23 = vmul.f32 %v3427_v0, %v3201_v55  ;;  %v1393_v48 = vadd.f32 %v1391_v10, %v1347_v13 }
 0x285   : > { %v1448_v16 = vrot.slane %v1416_v58, %v2460_v28  ;;  %v1436_v15 = vrot.slane %v1416_v58, %v2455_v24  ;;  %v1478_v44 = vrot.slane %v1461_v27, %v2460_v28  ;;  %v1482_v37 = vrot.slane %v1462_v59, %v2460_v28 }
 0x286   : > { %v1449_v12 = vmul.f32 %v1444_v31, %v3358_v54  ;;  %v1437_v39 = vmul.f32 %v1432_v17, %v3354_v61  ;;  %v1496_v9 = vmul.f32 %v3431_v8, %v3204_v40  ;;  %v1524_v60 = vrot.slane %v1495_v23, %v2460_v28  ;;  %v1594_v10 = vpop.permute.xlu0 %1593 }
 0x287   : > { %v1450_v55 = vmul.f32 %v1448_v16, %v3350_v49  ;;  %v1438_v41 = vmul.f32 %v1436_v15, %v3344_v33  ;;  %v1483_v38 = vmul.f32 %v1478_v44, %v2964_v51  ;;  %v1596_v34 = vpop.permute.xlu1 %1595  ;;  %v1484_v54 = vmul.f32 %v1482_v37, %v2968_v3  ;;  %v3666_v15 = vld [vmem:[#allocation17_spill] sm:$0xff]  ;;  %v3667_v44 = vld [vmem:[#allocation19_spill] sm:$0xff] }
 0x288   : > { %v1451_v2 = vadd.f32 %v1449_v12, %v1405_v30  ;;  %v1439_v57 = vadd.f32 %v1437_v39, %v1393_v48  ;;  %v1528_v61 = vrot.slane %v1496_v9, %v2460_v28  ;;  %v1529_v45 = vmul.f32 %v1524_v60, %v3374_v42  ;;  %v3668_v39 = vld [vmem:[#allocation18_spill] sm:$0xff]  ;;  %v3669_v37 = vld [vmem:[#allocation15_spill] sm:$0xff] }
 0x289   : > { %v1452_v53 = vadd.f32 %v1450_v55, %v1406_v1  ;;  %v1440_v32 = vadd.f32 %v1438_v41, %v1394_v29  ;;  %v1470_v40 = vrot.slane %v1462_v59, %v2455_v24  ;;  %v1516_v51 = vrot.slane %v1496_v9, %v2455_v24  ;;  %v3664_v29 = vld [vmem:[#allocation13_spill] sm:$0xff] }
 0x28a   : > { %v1485_v49 = vadd.f32 %v1483_v38, %v1451_v2  ;;  %v1530_v33 = vmul.f32 %v1528_v61, %v3384_v62  ;;  %v1466_v7 = vrot.slane %v1461_v27, %v2455_v24  ;;  %v1512_v3 = vrot.slane %v1495_v23, %v2455_v24  ;;  %v1636_v48 = vpop.permute.xlu0 %1635 }
 0x28b   : > { %v1486_v30 = vadd.f32 %v1484_v54, %v1452_v53  ;;  %v1472_v26 = vmul.f32 %v1470_v40, %v2966_v56  ;;  %1984 = vpow2.f32 %v3360_v46  ;;  %v1413_v1 = vadd.f32 %v3402_v47, %v1367_v63  ;;  %v1638_v59 = vpop.permute.xlu1 %1637 }
 0x28c   : > { %v1531_v42 = vadd.f32 %v1529_v45, %v1485_v49  ;;  %v1471_v13 = vmul.f32 %v1466_v7, %v2962_v14  ;;  %v1541_v62 = vmul.f32 %v3438_v52, %v3664_v29  ;;  %v1414_v58 = vadd.f32 %v3408_v35, %v1368_v43 }
 0x28d   : > { %v1532_v31 = vadd.f32 %v1530_v33, %v1486_v30  ;;  %v1474_v27 = vadd.f32 %v1472_v26, %v1440_v32  ;;  %v1518_v17 = vmul.f32 %v1516_v51, %v3378_v4  ;;  %v1517_v23 = vmul.f32 %v1512_v3, %v3367_v50  ;;  %v3665_v50 = vld [vmem:[#allocation14_spill] sm:$0xff]  ;;  %v3670_v32 = vld [vmem:[#allocation16_spill] sm:$0xff] }
 0x28e   : > { %v1473_v56 = vadd.f32 %v1471_v13, %v1439_v57  ;;  %v1554_v46 = vsel %vm1185_vm14, %v3414_v11, %v3392_v21  ;;  %v1570_v14 = vrot.slane %v1541_v62, %v2460_v28  ;;  %v1553_v47 = vsel %vm1185_vm14, %v3416_v18, %v3386_v20 }
 0x28f   : > { %v1520_v63 = vadd.f32 %v1518_v17, %v1474_v27  ;;  %v1558_v35 = vrot.slane %v1541_v62, %v2455_v24  ;;  %1986 = vpow2.f32 %v3362_v19  ;;  %v1633_v12 = vmul.f32 %v3667_v44, %v3666_v15  ;;  %v1642_v2 = vpop.permute.xlu1 %1641  ;;  %v3672_v62 = vld [vmem:[#allocation11_spill] sm:$0xff] }
 0x290   : > { %v1519_v4 = vadd.f32 %v1517_v23, %v1473_v56  ;;  %v1575_v43 = vmul.f32 %v1570_v14, %v1554_v46  ;;  %1988 = vpow2.f32 %v3665_v50  ;;  %v1634_v9 = vmul.f32 %v3669_v37, %v3668_v39 }
 0x291   : > { %v1563_v16 = vmul.f32 %v1558_v35, %v1553_v47  ;;  %v1459_v41 = vadd.f32 %v3418_v25, %v1413_v1  ;;  %v1460_v38 = vadd.f32 %v3423_v5, %v1414_v58  ;;  %v1662_v61 = vrot.slane %v1633_v12, %v2460_v28 }
 0x292   : > { %v1577_v55 = vadd.f32 %v1575_v43, %v1531_v42  ;;  %v1666_v53 = vrot.slane %v1634_v9, %v2460_v28  ;;  %v1552_v25 = vsel %vm1185_vm14, %v3392_v21, %v3414_v11  ;;  %v1644_v40 = vsel %vm1233_vm0, %v1638_v59, %v1642_v2  ;;  %v3671_v42 = vld [vmem:[#allocation12_spill] sm:$0xff] }
 0x293   : > { %v1565_v60 = vadd.f32 %v1563_v16, %v1519_v4  ;;  %v1493_v19 = vadd.f32 %v3427_v0, %v1459_v41  ;;  %v1494_v57 = vadd.f32 %v3431_v8, %v1460_v38  ;;  %v1640_v0 = vpop.permute.xlu0 %1639  ;;  %v1551_v8 = vsel %vm1185_vm14, %v3386_v20, %v3416_v18 }
 0x294   : > { %v1598_v49 = vsel %vm1209_vm15, %v3436_v6, %v1596_v34  ;;  %v1600_v33 = vsel %vm1209_vm15, %v1596_v34, %v3436_v6  ;;  %v1597_v51 = vsel %vm1209_vm15, %v3450_v36, %v1594_v10  ;;  %v1599_v20 = vsel %vm1209_vm15, %v1594_v10, %v3450_v36 }
 0x295   : > { %v1985_v54 = vpop.eup %1984  ;;  %v1539_v5 = vadd.f32 %v3438_v52, %v1493_v19  ;;  %v1646_v7 = vsel %vm1233_vm0, %v1642_v2, %v1638_v59  ;;  %v1667_v30 = vmul.f32 %v1662_v61, %v1644_v40  ;;  %v1654_v6 = vrot.slane %v1634_v9, %v2455_v24 }
 0x296   : > { %v1542_v45 = vmul.f32 %v1985_v54, %v3670_v32  ;;  %v1540_v21 = vadd.f32 %v1985_v54, %v1494_v57  ;;  %v1643_v34 = vsel %vm1233_vm0, %v1636_v48, %v1640_v0  ;;  %v1645_v36 = vsel %vm1233_vm0, %v1640_v0, %v1636_v48 }
 0x297   : > { %v1650_v10 = vrot.slane %v1633_v12, %v2455_v24  ;;  %v1668_v22 = vmul.f32 %v1666_v53, %v1646_v7  ;;  %v1656_v48 = vmul.f32 %v1654_v6, %v1645_v36 }
 0x298   : > { %v1574_v11 = vrot.slane %v1542_v45, %v2460_v28  ;;  %v1562_v52 = vrot.slane %v1542_v45, %v2455_v24 }
 0x299   : > { %v1987_v18 = vpop.eup %1986  ;;  %v1655_v50 = vmul.f32 %v1650_v10, %v1643_v34 }
 0x29a   : > { %v1989_v26 = vpop.eup %1988  ;;  %v1576_v3 = vmul.f32 %v1574_v11, %v1552_v25  ;;  %v1564_v1 = vmul.f32 %v1562_v52, %v1551_v8  ;;  %v1587_v13 = vmul.f32 %v1987_v18, %v3671_v42  ;;  %v1585_v29 = vadd.f32 %v1987_v18, %v1539_v5 }
 0x29b   : > { %v1588_v58 = vmul.f32 %v1989_v26, %v3672_v62  ;;  %v1586_v27 = vadd.f32 %v1989_v26, %v1540_v21 }
 0x29c   : > { %v1578_v17 = vadd.f32 %v1576_v3, %v1532_v31  ;;  %v1566_v59 = vadd.f32 %v1564_v1, %v1520_v63  ;;  %v1616_v56 = vrot.slane %v1587_v13, %v2460_v28  ;;  %v1604_v23 = vrot.slane %v1587_v13, %v2455_v24 }
 0x29d   : > { %v1620_v46 = vrot.slane %v1588_v58, %v2460_v28  ;;  %v1608_v14 = vrot.slane %v1588_v58, %v2455_v24  ;;  %v1631_v47 = vadd.f32 %v3667_v44, %v1585_v29  ;;  %v1632_v35 = vadd.f32 %v3669_v37, %v1586_v27 }
 0x29e   : > { %v1621_v4 = vmul.f32 %v1616_v56, %v1598_v49  ;;  %v1609_v43 = vmul.f32 %v1604_v23, %v1597_v51 }
 0x29f   : > { %v1622_v31 = vmul.f32 %v1620_v46, %v1600_v33  ;;  %v1610_v63 = vmul.f32 %v1608_v14, %v1599_v20  ;;  %1990 = vrcp.f32 %v1631_v47 }
 0x2a0   : > { %v1623_v16 = vadd.f32 %v1621_v4, %v1577_v55  ;;  %v1611_v15 = vadd.f32 %v1609_v43, %v1565_v60  ;;  %1992 = vrcp.f32 %v1632_v35 }
 0x2a1   : > { %v1624_v12 = vadd.f32 %v1622_v31, %v1578_v17  ;;  %v1612_v39 = vadd.f32 %v1610_v63, %v1566_v59 }
 0x2a2   : > { %v1669_v9 = vadd.f32 %v1667_v30, %v1623_v16  ;;  %v1657_v41 = vadd.f32 %v1655_v50, %v1611_v15 }
 0x2a3   : > { %v1670_v44 = vadd.f32 %v1668_v22, %v1624_v12  ;;  %v1658_v38 = vadd.f32 %v1656_v48, %v1612_v39 }
 0x2a9   : > { %v1991_v37 = vpop.eup %1990 }
 0x2aa   : > { %v1993_v2 = vpop.eup %1992  ;;  %v1686_v19 = vrot.slane %v1991_v37, %v2460_v28  ;;  %v1676_v57 = vrot.slane %v1991_v37, %v2455_v24 }
 0x2ab   : > { %v1690_v55 = vrot.slane %v1993_v2, %v2460_v28  ;;  %v1680_v60 = vrot.slane %v1993_v2, %v2455_v24 }
 0x2ac   : > { %v1691_v54 = vmul.f32 %v1686_v19, %v1669_v9  ;;  %v1681_v61 = vmul.f32 %v1676_v57, %v1657_v41 }
 0x2ad   : > { %v1692_v53 = vmul.f32 %v1690_v55, %v1670_v44  ;;  %v1682_v32 = vmul.f32 %v1680_v60, %v1658_v38 }
 0x2ae   : > { %1695 = vst [vmem:[%s256_s23 + $0x10] sm:$0xff] %v1691_v54  ;;  %1693 = vst [vmem:[%s256_s23] sm:$0xff] %v1681_v61 }
 0x2af   : > { %1696 = vst [vmem:[%s256_s23 + $0x18] sm:$0xff] %v1692_v53  ;;  %1694 = vst [vmem:[%s256_s23 + $0x8] sm:$0xff] %v1682_v32 }
 0x2b0   : > { %2052 = shalt.err (!%p2049_p11)
}
 0x2b1   : > { %s2053_s17 = scalar_lea.hbm %s3554_s15, 512  ;;  %s2057_s9 = scalar_lea.hbm %s3606_s5, 1024 }
 0x2b2   : > { %p2054_p0 = scmp.ne.s32.totalorder %s3554_s15, %s2053_s17  ;;  %p2058_p6 = scmp.lt.u32.totalorder %s3554_s15, %s3606_s5 }
 0x2b3   : > { %p2059_p3 = scmp.lt.u32.totalorder %s2057_s9, %s2053_s17  ;;  %p2061_p5 = scmp.lt.u32.totalorder %s2053_s17, %s3554_s15 }
 0x2b4   : > { %p2055_p2 = pnand %p2054_p0, %p3673_p12 }
 0x2b5   : > { %p2060_p13 = por %p2059_p3, %p2058_p6 }
 0x2b6   : > { %p2056_p7 = pneg %p2055_p2 }
 0x2b7   : > { %p2062_p8 = por %p2061_p5, %p2060_p13 }
 0x2b9   : > { %p2063_p9 = pnand %p2062_p8, %p2056_p7 }
 0x2bb   : > { %2066 = shalt.err (!%p2063_p9)
}
 0x2bc   : > { %s2133_s28 = smov 256  }
 0x2bd   : > { %1841 = dma.vmem_to_hbm [thread:$0]  (%p3673_p12), %s3556_s26, 512, %s3554_s15, %s1698_s22, %s2133_s28, %s2133_s28, %s2127_s11  }
 0x2be PF: > { %s1726_s10 = sand.u32 1, %s2097_s18   ;;  %p3674_p10 = scmp.ne.s32.totalorder %s3630_s6, 0 }
 0x2bf   : > { %p3675_p1 = scmp.ge.s32.totalorder %s2109_s21, 2  ;;  %s1727_s16 = scalar_lea.sflag [#allocation4], %s1726_s10 }
 0x2c1   : > { %p1852_p4 = pnand %p3675_p1, %p3674_p10 }
 0x2c3   : > { %2092 = dma.done.wait (!%p1852_p4), %s1727_s16, 512  }
 0x2c4   : > { %2094 = vsyncadd (!%p1852_p4), %s1727_s16, 4294966784  ;;  %p19_p11 = scmp.ge.s32.totalorder %s2189_s24, 4   ;;  %s3676_s18 = smov %s2101_s19 }
 0x2c5   : > { %s3677_s19 = smov %s2105_s20  ;;  %s3678_s20 = smov %s2201_s27 }
 0x2c6   : > { %s3679_s21 = smov %s2189_s24  ;;  %21 = sbr.rel (!%p19_p11) target bundleno = 6 (0x6), region = 109 }
 0x2cd   :  { %1732 = vsyncpa [#allocation3], 1 }
 0x2ce   :  { %1734 = vsyncpa [#allocation3 + $0x1], 1 }
 0x2cf   :  { %1735 = vsyncpa [#allocation4], 1 }
 0x2d0   :  { %1737 = vsyncpa [#allocation4 + $0x1], 1 }
 0x2d1   :  { %1738 = vsyncpa [#allocation5], 1 }
 0x2d2   :  { %1740 = vsyncpa [#allocation5 + $0x1], 1 }

</bundles_post_ra>
